<compile_context>
chip_gen: v7x
topology: tpu7x:2x2x1
jax: 0.10.0
libtpu: 0.0.40
codegen_flags: <defaults>
</compile_context>

<pallas_src>
import functools

import jax
import jax.numpy as jnp
import numpy as np
from jax import lax
from jax.experimental import pallas as pl
from jax.experimental.pallas import tpu as pltpu


# ------------------------------ Pallas kernel ------------------------------ #

def _silu(v):
    # SiLU(v) = v * sigmoid(v); the reciprocal rides the (otherwise idle) EUP.
    return v * pl.reciprocal(1.0 + jnp.exp(-v), approx=True)


def _res_unit_kernel(x_ref, w1_ref, wb0_ref, wb1_ref, wb2_ref,
                     s1_ref, c1_ref, s2_ref, c2_ref, o_ref,
                     *, n_reps, shortcut, height):
    """Fused ResUnit_n on one (SUB_BATCH x LANE_PACK)-image block in VMEM.

    Activation layout: (M, L) with M = SUB_BATCH*H rows (image, y) on sublanes
    and L = LANE_PACK*W*C lanes (image, x, channel).  In this layout:
      * 1x1 conv  == one matmul with kron(I_{k*W}, w1^T)          (L1, L1)
      * 3x3 conv  == three accumulated matmuls against block-banded weights
        (band = 3 horizontal taps + horizontal zero pad); the three vertical
        taps come from sublane rolls + a per-image-boundary zero mask.
    """
    x = x_ref[0].astype(jnp.float32)           # (M, L1)
    w1 = w1_ref[...]                           # (L1, L1) bf16
    wb0 = wb0_ref[...]                         # (L1, L2) bf16  (tap y-1)
    wb1 = wb1_ref[...]                         # (L1, L2) bf16  (tap y  )
    wb2 = wb2_ref[...]                         # (L1, L2) bf16  (tap y+1)
    s1 = s1_ref[...]; c1 = c1_ref[...]         # (1, L1) f32 folded BN1
    s2 = s2_ref[...]; c2 = c2_ref[...]         # (1, L2) f32 folded BN2

    m = x.shape[0]
    # Per-image vertical-padding masks (hoisted out of the repeat loop): rows
    # at y == 0 / y == H-1 of each sublane-batched image get a zero neighbor.
    rid = lax.broadcasted_iota(jnp.int32, x.shape, 0)
    not_top = (rid % height) != 0
    not_bot = (rid % height) != (height - 1)

    def one_rep(v):
        # ---- CBL(1x1): block-diagonal matmul + folded BN + SiLU ----
        h = jnp.dot(v.astype(jnp.bfloat16), w1,
                    preferred_element_type=jnp.float32)
        h = _silu(h * s1 + c1)                                   # (M, L1) f32

        # ---- CBL(3x3): vertical taps via sublane roll + boundary mask ----
        h_prev = jnp.where(not_top, pltpu.roll(h, 1, 0), 0.0)     # row y <- y-1
        h_next = jnp.where(not_bot, pltpu.roll(h, m - 1, 0), 0.0)  # row y <- y+1
        a = jnp.dot(h_prev.astype(jnp.bfloat16), wb0,
                    preferred_element_type=jnp.float32)
        a = a + jnp.dot(h.astype(jnp.bfloat16), wb1,
                        preferred_element_type=jnp.float32)
        a = a + jnp.dot(h_next.astype(jnp.bfloat16), wb2,
                        preferred_element_type=jnp.float32)
        return _silu(a * s2 + c2)                                 # (M, L2) f32

    if n_reps <= 4:
        out = x
        for _ in range(n_reps):          # shared weights each repeat
            out = one_rep(out)
    else:
        # Large n: visible loop keeps live ranges bounded (no vreg spills).
        out = lax.fori_loop(0, n_reps, lambda _, v: one_rep(v), x)

    if shortcut:                          # static flag; reuses x already in VMEM
        out = out + x
    o_ref[0] = out.astype(o_ref.dtype)


# ------------------------------ pallas wrapper ------------------------------ #

def _run_packed(xp, params, n_reps, *, height, shortcut):
    """Run the fused kernel on lane/sublane-packed activations (G, M, L1)."""
    G, M, L1 = xp.shape
    L2 = params["w3_0"].shape[1]
    kernel = functools.partial(_res_unit_kernel, n_reps=n_reps,
                               shortcut=shortcut, height=height)
    return pl.pallas_call(
        kernel,
        out_shape=jax.ShapeDtypeStruct((G, M, L2), jnp.bfloat16),
        grid=(G,),
        in_specs=[
            pl.BlockSpec((1, M, L1), lambda g: (g, 0, 0)),   # activations
            pl.BlockSpec((L1, L1), lambda g: (0, 0)),        # 1x1 weights
            pl.BlockSpec((L1, L2), lambda g: (0, 0)),        # 3x3 band (y-1)
            pl.BlockSpec((L1, L2), lambda g: (0, 0)),        # 3x3 band (y)
            pl.BlockSpec((L1, L2), lambda g: (0, 0)),        # 3x3 band (y+1)
            pl.BlockSpec((1, L1), lambda g: (0, 0)),         # bn1 scale
            pl.BlockSpec((1, L1), lambda g: (0, 0)),         # bn1 bias
            pl.BlockSpec((1, L2), lambda g: (0, 0)),         # bn2 scale
            pl.BlockSpec((1, L2), lambda g: (0, 0)),         # bn2 bias
        ],
        out_specs=pl.BlockSpec((1, M, L2), lambda g: (g, 0, 0)),
        compiler_params=pltpu.CompilerParams(
            dimension_semantics=("parallel",),
        ),
    )(xp, params["w1"], params["w3_0"], params["w3_1"], params["w3_2"],
      params["s1"], params["b1"], params["s2"], params["b2"])


@functools.partial(jax.jit, static_argnames=("n", "sub_batch"))
def res_unit_n_forward(x_nchw, params, n, sub_batch=None):
    """Pallas ResUnit_n forward, NCHW in / NCHW out, inference-mode BN.

    The NCHW <-> packed transposes below are interface plumbing only; an
    in-network caller should keep activations in the packed (G, M, L) bf16
    layout and call _run_packed directly to avoid the extra HBM round trips.
    """
    N, C1, H, W = x_nchw.shape
    L1 = params["w1"].shape[0]
    L2 = params["w3_0"].shape[1]
    WC1 = W * C1
    k = L1 // WC1                              # lane-pack factor
    assert k >= 1 and k * WC1 == L1, "parameter / input shape mismatch"
    WC2 = L2 // k
    C2 = WC2 // W
    shortcut = (C1 == C2)
    if n > 1:
        # Shared-weight repeats feed the C2-channel output back into the
        # C1xC1 1x1 conv (same constraint as the PyTorch module).
        assert C1 == C2

    if sub_batch is None:
        sub_batch = max(1, 128 // H)           # M = sub_batch*H ~ 128 rows
    ipb = sub_batch * k                        # images per grid step
    G = -(-N // ipb)
    N_pad = G * ipb

    # NCHW -> lane-packed (N, H, W*C1), bf16 at the kernel boundary.
    x = jnp.transpose(x_nchw, (0, 2, 3, 1)).reshape(N, H, WC1)
    x = x.astype(jnp.bfloat16)
    if N_pad != N:
        x = jnp.pad(x, ((0, N_pad - N), (0, 0), (0, 0)))
    # Pack: rows = (sub_batch image, y), lanes = (lane-pack image, x, channel).
    xp = x.reshape(G, sub_batch, k, H, WC1).transpose(0, 1, 3, 2, 4)
    xp = xp.reshape(G, sub_batch * H, L1)

    outp = _run_packed(xp, params, n, height=H, shortcut=shortcut)

    # Unpack back to NCHW.
    out = outp.reshape(G, sub_batch, H, k, WC2).transpose(0, 1, 3, 2, 4)
    out = out.reshape(N_pad, H, W, C2)[:N]
    return jnp.transpose(out, (0, 3, 1, 2)).astype(jnp.float32)


# ------------------------------ parameter prep ------------------------------ #

def fold_bn(gamma, beta, mean, var, eps=1e-5):
    """Fold inference-mode BatchNorm into per-channel (scale, bias)."""
    gamma = np.asarray(gamma, np.float32)
    beta = np.asarray(beta, np.float32)
    mean = np.asarray(mean, np.float32)
    var = np.asarray(var, np.float32)
    scale = gamma / np.sqrt(var + eps)
    bias = beta - mean * scale
    return scale, bias


def prepare_params(w1_oihw, bn1, w3_oihw, bn2, W, k=2, eps=1e-5):
    """Expand PyTorch OIHW conv weights to lane-packed banded matrices.

    k = number of images packed on the lane axis (2 -> 128 lanes for W*C=64,
    use 4 on v6e/v7x for 256 lanes).
    """
    w1 = np.asarray(w1_oihw, np.float32)            # (C1, C1, 1, 1)
    w3 = np.asarray(w3_oihw, np.float32)            # (C2, C1, 3, 3)
    C1 = w1.shape[1]
    C2 = w3.shape[0]

    # 1x1 conv on lane-packed rows == block-diagonal matmul kron(I_{kW}, w1^T).
    w1_bd = np.kron(np.eye(k * W, dtype=np.float32), w1[:, :, 0, 0].T)

    # 3x3 conv: per vertical tap ky, a block-banded matrix applying the three
    # horizontal taps (horizontal zero padding is implicit in the band);
    # kron(I_k, .) keeps lane-packed images independent.
    bands = []
    for ky in range(3):
        b = np.zeros((W * C1, W * C2), np.float32)
        for kx in range(3):
            b += np.kron(np.eye(W, k=1 - kx, dtype=np.float32),
                         w3[:, :, ky, kx].T)
        bands.append(np.kron(np.eye(k, dtype=np.float32), b))

    s1, b1 = fold_bn(*bn1, eps=eps)
    s2, b2 = fold_bn(*bn2, eps=eps)
    return {
        "w1": jnp.asarray(w1_bd, jnp.bfloat16),
        "w3_0": jnp.asarray(bands[0], jnp.bfloat16),
        "w3_1": jnp.asarray(bands[1], jnp.bfloat16),
        "w3_2": jnp.asarray(bands[2], jnp.bfloat16),
        "s1": jnp.asarray(np.tile(s1, k * W).reshape(1, -1), jnp.float32),
        "b1": jnp.asarray(np.tile(b1, k * W).reshape(1, -1), jnp.float32),
        "s2": jnp.asarray(np.tile(s2, k * W).reshape(1, -1), jnp.float32),
        "b2": jnp.asarray(np.tile(b2, k * W).reshape(1, -1), jnp.float32),
    }


# ------------------------------ pure-JAX reference -------------------------- #

def ref_forward(x_nchw, w1_oihw, bn1, w3_oihw, bn2, n, eps=1e-5):
    N, C1, H, W = x_nchw.shape
    C2 = w3_oihw.shape[0]
    shortcut = C1 == C2

    def bn(h, p):
        g, b, m, v = p
        return ((h - m[None, :, None, None]) / jnp.sqrt(v[None, :, None, None] + eps)
                * g[None, :, None, None] + b[None, :, None, None])

    def silu(h):
        return h * jax.nn.sigmoid(h)

    out = x_nchw
    for _ in range(n):
        h = jnp.einsum('nchw,dc->ndhw', out, w1_oihw[:, :, 0, 0],
                       precision=lax.Precision.HIGHEST)
        h = silu(bn(h, bn1))
        hp = jnp.pad(h, ((0, 0), (0, 0), (1, 1), (1, 1)))
        o = jnp.zeros((N, C2, H, W), jnp.float32)
        for dy in range(3):
            for dx in range(3):
                o = o + jnp.einsum('nchw,dc->ndhw',
                                   hp[:, :, dy:dy + H, dx:dx + W],
                                   w3_oihw[:, :, dy, dx],
                                   precision=lax.Precision.HIGHEST)
        out = silu(bn(o, bn2))
    if shortcut:
        out = out + x_nchw
    return out


# ----------------------------------- main ----------------------------------- #

if __name__ == "__main__":
    # 32 images of (4, 16, 16): sub_batch=8 (M=128 rows) x lane_pack=2
    # (128 lanes) -> 16 images per grid step, grid=(2,) (both v7x cores busy).
    N, C1, C2, H, W, n_reps = 32, 4, 4, 16, 16, 2
    LANE_PACK = 2      # 128-lane output (v5e sweet spot); use 4 on v6e/v7x

    key = jax.random.PRNGKey(0)
    ks = jax.random.split(key, 11)
    x = jax.random.normal(ks[0], (N, C1, H, W), jnp.float32)

    # Deterministic synthetic parameters (PyTorch OIHW conv weights, BN stats).
    w1 = jax.random.normal(ks[1], (C1, C1, 1, 1), jnp.float32) * 0.3
    w3 = jax.random.normal(ks[2], (C2, C1, 3, 3), jnp.float32) * 0.1
    g1 = jax.random.uniform(ks[3], (C1,), jnp.float32, 0.5, 1.5)
    b1 = jax.random.normal(ks[4], (C1,), jnp.float32) * 0.1
    m1 = jax.random.normal(ks[5], (C1,), jnp.float32) * 0.1
    v1 = jax.random.uniform(ks[6], (C1,), jnp.float32, 0.5, 1.5)
    g2 = jax.random.uniform(ks[7], (C2,), jnp.float32, 0.5, 1.5)
    b2 = jax.random.normal(ks[8], (C2,), jnp.float32) * 0.1
    m2 = jax.random.normal(ks[9], (C2,), jnp.float32) * 0.1
    v2 = jax.random.uniform(ks[10], (C2,), jnp.float32, 0.5, 1.5)

    params = prepare_params(w1, (g1, b1, m1, v1), w3, (g2, b2, m2, v2), W,
                            k=LANE_PACK)

    out = res_unit_n_forward(x, params, n=n_reps)
    out = jax.block_until_ready(out)
    assert out.shape == (N, C2, H, W)

    ref = ref_forward(x, w1, (g1, b1, m1, v1), w3, (g2, b2, m2, v2), n_reps)
    # bf16 I/O + bf16 MXU operands vs f32-HIGHEST reference -> relaxed tol.
    np.testing.assert_allclose(np.asarray(out), np.asarray(ref),
                               atol=5e-2, rtol=5e-2)

    print("KERNEL_OK")
</pallas_src>

<mosaic_0001>
module attributes {stable_mosaic.version = 11 : i64} {
  func.func @_res_unit_kernel(%arg0: i32, %arg1: memref<1x128x128xbf16, #tpu.memory_space<vmem>>, %arg2: memref<128x128xbf16, #tpu.memory_space<vmem>>, %arg3: memref<128x128xbf16, #tpu.memory_space<vmem>>, %arg4: memref<128x128xbf16, #tpu.memory_space<vmem>>, %arg5: memref<128x128xbf16, #tpu.memory_space<vmem>>, %arg6: memref<1x128xf32, #tpu.memory_space<vmem>>, %arg7: memref<1x128xf32, #tpu.memory_space<vmem>>, %arg8: memref<1x128xf32, #tpu.memory_space<vmem>>, %arg9: memref<1x128xf32, #tpu.memory_space<vmem>>, %arg10: memref<1x128x128xbf16, #tpu.memory_space<vmem>>) attributes {dimension_semantics = [#tpu.dimension_semantics<parallel>], iteration_bounds = array<i64: 2>, scalar_prefetch = 0 : i64, scratch_operands = 0 : i64, tpu.core_type = #tpu.core_type<tc>, window_params = [{transform_indices = @transform_0, window_bounds = array<i64: 1, 128, 128>}, {pipeline_mode = #tpu.pipeline_mode<synchronous>, transform_indices = @transform_1, window_bounds = array<i64: 128, 128>}, {pipeline_mode = #tpu.pipeline_mode<synchronous>, transform_indices = @transform_2, window_bounds = array<i64: 128, 128>}, {pipeline_mode = #tpu.pipeline_mode<synchronous>, transform_indices = @transform_3, window_bounds = array<i64: 128, 128>}, {pipeline_mode = #tpu.pipeline_mode<synchronous>, transform_indices = @transform_4, window_bounds = array<i64: 128, 128>}, {pipeline_mode = #tpu.pipeline_mode<synchronous>, transform_indices = @transform_5, window_bounds = array<i64: 1, 128>}, {pipeline_mode = #tpu.pipeline_mode<synchronous>, transform_indices = @transform_6, window_bounds = array<i64: 1, 128>}, {pipeline_mode = #tpu.pipeline_mode<synchronous>, transform_indices = @transform_7, window_bounds = array<i64: 1, 128>}, {pipeline_mode = #tpu.pipeline_mode<synchronous>, transform_indices = @transform_8, window_bounds = array<i64: 1, 128>}, {transform_indices = @transform_9, window_bounds = array<i64: 1, 128, 128>}]} {
    %c0 = arith.constant 0 : index
    %c0_0 = arith.constant 0 : index
    %c0_1 = arith.constant 0 : index
    %0 = vector.load %arg1[%c0, %c0_0, %c0_1] : memref<1x128x128xbf16, #tpu.memory_space<vmem>>, vector<1x128x128xbf16>
    %1 = vector.shape_cast %0 : vector<1x128x128xbf16> to vector<128x128xbf16>
    %2 = arith.extf %1 : vector<128x128xbf16> to vector<128x128xf32>
    %c0_2 = arith.constant 0 : index
    %c0_3 = arith.constant 0 : index
    %3 = vector.load %arg2[%c0_2, %c0_3] : memref<128x128xbf16, #tpu.memory_space<vmem>>, vector<128x128xbf16>
    %c0_4 = arith.constant 0 : index
    %c0_5 = arith.constant 0 : index
    %4 = vector.load %arg3[%c0_4, %c0_5] : memref<128x128xbf16, #tpu.memory_space<vmem>>, vector<128x128xbf16>
    %c0_6 = arith.constant 0 : index
    %c0_7 = arith.constant 0 : index
    %5 = vector.load %arg4[%c0_6, %c0_7] : memref<128x128xbf16, #tpu.memory_space<vmem>>, vector<128x128xbf16>
    %c0_8 = arith.constant 0 : index
    %c0_9 = arith.constant 0 : index
    %6 = vector.load %arg5[%c0_8, %c0_9] : memref<128x128xbf16, #tpu.memory_space<vmem>>, vector<128x128xbf16>
    %c0_10 = arith.constant 0 : index
    %c0_11 = arith.constant 0 : index
    %7 = vector.load %arg6[%c0_10, %c0_11] : memref<1x128xf32, #tpu.memory_space<vmem>>, vector<1x128xf32>
    %c0_12 = arith.constant 0 : index
    %c0_13 = arith.constant 0 : index
    %8 = vector.load %arg7[%c0_12, %c0_13] : memref<1x128xf32, #tpu.memory_space<vmem>>, vector<1x128xf32>
    %c0_14 = arith.constant 0 : index
    %c0_15 = arith.constant 0 : index
    %9 = vector.load %arg8[%c0_14, %c0_15] : memref<1x128xf32, #tpu.memory_space<vmem>>, vector<1x128xf32>
    %c0_16 = arith.constant 0 : index
    %c0_17 = arith.constant 0 : index
    %10 = vector.load %arg9[%c0_16, %c0_17] : memref<1x128xf32, #tpu.memory_space<vmem>>, vector<1x128xf32>
    %11 = tpu.iota {dimensions = array<i32: 0>} : vector<128x128xi32>
    %c16_i32 = arith.constant 16 : i32
    %c0_i32 = arith.constant 0 : i32
    %12 = arith.cmpi eq, %c16_i32, %c0_i32 : i32
    %c1_i32 = arith.constant 1 : i32
    %13 = arith.select %12, %c1_i32, %c16_i32 : i32
    %14 = vector.broadcast %13 : i32 to vector<128x128xi32>
    %15 = arith.remsi %11, %14 : vector<128x128xi32>
    %c0_i32_18 = arith.constant 0 : i32
    %16 = vector.broadcast %c0_i32_18 : i32 to vector<128x128xi32>
    %17 = arith.cmpi ne, %15, %16 : vector<128x128xi32>
    %c0_i32_19 = arith.constant 0 : i32
    %18 = vector.broadcast %c0_i32_19 : i32 to vector<128x128xi32>
    %19 = arith.cmpi slt, %15, %18 : vector<128x128xi32>
    %c0_i32_20 = arith.constant 0 : i32
    %20 = arith.cmpi slt, %13, %c0_i32_20 : i32
    %21 = vector.broadcast %20 : i1 to vector<128x128xi1>
    %22 = vector.broadcast %21 : vector<128x128xi1> to vector<128x128xi1>
    %23 = arith.xori %19, %22 : vector<128x128xi1>
    %24 = arith.andi %23, %17 : vector<128x128xi1>
    %25 = vector.broadcast %13 : i32 to vector<128x128xi32>
    %26 = arith.addi %15, %25 : vector<128x128xi32>
    %27 = arith.select %24, %26, %15 : vector<128x128xi1>, vector<128x128xi32>
    %c0_i32_21 = arith.constant 0 : i32
    %28 = vector.broadcast %c0_i32_21 : i32 to vector<128x128xi32>
    %29 = arith.cmpi ne, %27, %28 : vector<128x128xi32>
    %c16_i32_22 = arith.constant 16 : i32
    %c0_i32_23 = arith.constant 0 : i32
    %30 = arith.cmpi eq, %c16_i32_22, %c0_i32_23 : i32
    %c1_i32_24 = arith.constant 1 : i32
    %31 = arith.select %30, %c1_i32_24, %c16_i32_22 : i32
    %32 = vector.broadcast %31 : i32 to vector<128x128xi32>
    %33 = arith.remsi %11, %32 : vector<128x128xi32>
    %c0_i32_25 = arith.constant 0 : i32
    %34 = vector.broadcast %c0_i32_25 : i32 to vector<128x128xi32>
    %35 = arith.cmpi ne, %33, %34 : vector<128x128xi32>
    %c0_i32_26 = arith.constant 0 : i32
    %36 = vector.broadcast %c0_i32_26 : i32 to vector<128x128xi32>
    %37 = arith.cmpi slt, %33, %36 : vector<128x128xi32>
    %c0_i32_27 = arith.constant 0 : i32
    %38 = arith.cmpi slt, %31, %c0_i32_27 : i32
    %39 = vector.broadcast %38 : i1 to vector<128x128xi1>
    %40 = vector.broadcast %39 : vector<128x128xi1> to vector<128x128xi1>
    %41 = arith.xori %37, %40 : vector<128x128xi1>
    %42 = arith.andi %41, %35 : vector<128x128xi1>
    %43 = vector.broadcast %31 : i32 to vector<128x128xi32>
    %44 = arith.addi %33, %43 : vector<128x128xi32>
    %45 = arith.select %42, %44, %33 : vector<128x128xi1>, vector<128x128xi32>
    %c15_i32 = arith.constant 15 : i32
    %46 = vector.broadcast %c15_i32 : i32 to vector<128x128xi32>
    %47 = arith.cmpi ne, %45, %46 : vector<128x128xi32>
    %48 = arith.truncf %2 : vector<128x128xf32> to vector<128x128xbf16>
    %cst = arith.constant dense<0.000000e+00> : vector<128x128xf32>
    %49 = tpu.matmul %48, %3, %cst {dimension_numbers = #tpu.dot_dimension_numbers<[1], [0], [0], [1], [0, 0, 1, 1], [], []>} : vector<128x128xbf16>, vector<128x128xbf16>, vector<128x128xf32> -> vector<128x128xf32>
    %50 = vector.broadcast %7 : vector<1x128xf32> to vector<128x128xf32>
    %51 = arith.mulf %49, %50 : vector<128x128xf32>
    %52 = vector.broadcast %8 : vector<1x128xf32> to vector<128x128xf32>
    %53 = arith.addf %51, %52 : vector<128x128xf32>
    %cst_28 = arith.constant 0.000000e+00 : f32
    %54 = vector.broadcast %cst_28 : f32 to vector<128x128xf32>
    %55 = arith.subf %54, %53 : vector<128x128xf32>
    %56 = math.exp %55 : vector<128x128xf32>
    %cst_29 = arith.constant 1.000000e+00 : f32
    %57 = vector.broadcast %cst_29 : f32 to vector<128x128xf32>
    %58 = arith.addf %57, %56 : vector<128x128xf32>
    %59 = tpu.reciprocal %58 {approx = true} : vector<128x128xf32> -> vector<128x128xf32>
    %60 = arith.mulf %53, %59 : vector<128x128xf32>
    %c1_i32_30 = arith.constant 1 : i32
    %61 = tpu.dynamic_rotate %60 by %c1_i32_30 dim 0 : vector<128x128xf32>, i32 -> vector<128x128xf32>
    %cst_31 = arith.constant 0.000000e+00 : f32
    %62 = vector.broadcast %cst_31 : f32 to vector<128x128xf32>
    %63 = arith.select %29, %61, %62 : vector<128x128xi1>, vector<128x128xf32>
    %c127_i32 = arith.constant 127 : i32
    %64 = tpu.dynamic_rotate %60 by %c127_i32 dim 0 : vector<128x128xf32>, i32 -> vector<128x128xf32>
    %cst_32 = arith.constant 0.000000e+00 : f32
    %65 = vector.broadcast %cst_32 : f32 to vector<128x128xf32>
    %66 = arith.select %47, %64, %65 : vector<128x128xi1>, vector<128x128xf32>
    %67 = arith.truncf %63 : vector<128x128xf32> to vector<128x128xbf16>
    %cst_33 = arith.constant dense<0.000000e+00> : vector<128x128xf32>
    %68 = tpu.matmul %67, %4, %cst_33 {dimension_numbers = #tpu.dot_dimension_numbers<[1], [0], [0], [1], [0, 0, 1, 1], [], []>} : vector<128x128xbf16>, vector<128x128xbf16>, vector<128x128xf32> -> vector<128x128xf32>
    %69 = arith.truncf %60 : vector<128x128xf32> to vector<128x128xbf16>
    %cst_34 = arith.constant dense<0.000000e+00> : vector<128x128xf32>
    %70 = tpu.matmul %69, %5, %cst_34 {dimension_numbers = #tpu.dot_dimension_numbers<[1], [0], [0], [1], [0, 0, 1, 1], [], []>} : vector<128x128xbf16>, vector<128x128xbf16>, vector<128x128xf32> -> vector<128x128xf32>
    %71 = arith.addf %68, %70 : vector<128x128xf32>
    %72 = arith.truncf %66 : vector<128x128xf32> to vector<128x128xbf16>
    %cst_35 = arith.constant dense<0.000000e+00> : vector<128x128xf32>
    %73 = tpu.matmul %72, %6, %cst_35 {dimension_numbers = #tpu.dot_dimension_numbers<[1], [0], [0], [1], [0, 0, 1, 1], [], []>} : vector<128x128xbf16>, vector<128x128xbf16>, vector<128x128xf32> -> vector<128x128xf32>
    %74 = arith.addf %71, %73 : vector<128x128xf32>
    %75 = vector.broadcast %9 : vector<1x128xf32> to vector<128x128xf32>
    %76 = arith.mulf %74, %75 : vector<128x128xf32>
    %77 = vector.broadcast %10 : vector<1x128xf32> to vector<128x128xf32>
    %78 = arith.addf %76, %77 : vector<128x128xf32>
    %cst_36 = arith.constant 0.000000e+00 : f32
    %79 = vector.broadcast %cst_36 : f32 to vector<128x128xf32>
    %80 = arith.subf %79, %78 : vector<128x128xf32>
    %81 = math.exp %80 : vector<128x128xf32>
    %cst_37 = arith.constant 1.000000e+00 : f32
    %82 = vector.broadcast %cst_37 : f32 to vector<128x128xf32>
    %83 = arith.addf %82, %81 : vector<128x128xf32>
    %84 = tpu.reciprocal %83 {approx = true} : vector<128x128xf32> -> vector<128x128xf32>
    %85 = arith.mulf %78, %84 : vector<128x128xf32>
    %86 = arith.truncf %85 : vector<128x128xf32> to vector<128x128xbf16>
    %cst_38 = arith.constant dense<0.000000e+00> : vector<128x128xf32>
    %87 = tpu.matmul %86, %3, %cst_38 {dimension_numbers = #tpu.dot_dimension_numbers<[1], [0], [0], [1], [0, 0, 1, 1], [], []>} : vector<128x128xbf16>, vector<128x128xbf16>, vector<128x128xf32> -> vector<128x128xf32>
    %88 = vector.broadcast %7 : vector<1x128xf32> to vector<128x128xf32>
    %89 = arith.mulf %87, %88 : vector<128x128xf32>
    %90 = vector.broadcast %8 : vector<1x128xf32> to vector<128x128xf32>
    %91 = arith.addf %89, %90 : vector<128x128xf32>
    %cst_39 = arith.constant 0.000000e+00 : f32
    %92 = vector.broadcast %cst_39 : f32 to vector<128x128xf32>
    %93 = arith.subf %92, %91 : vector<128x128xf32>
    %94 = math.exp %93 : vector<128x128xf32>
    %cst_40 = arith.constant 1.000000e+00 : f32
    %95 = vector.broadcast %cst_40 : f32 to vector<128x128xf32>
    %96 = arith.addf %95, %94 : vector<128x128xf32>
    %97 = tpu.reciprocal %96 {approx = true} : vector<128x128xf32> -> vector<128x128xf32>
    %98 = arith.mulf %91, %97 : vector<128x128xf32>
    %c1_i32_41 = arith.constant 1 : i32
    %99 = tpu.dynamic_rotate %98 by %c1_i32_41 dim 0 : vector<128x128xf32>, i32 -> vector<128x128xf32>
    %cst_42 = arith.constant 0.000000e+00 : f32
    %100 = vector.broadcast %cst_42 : f32 to vector<128x128xf32>
    %101 = arith.select %29, %99, %100 : vector<128x128xi1>, vector<128x128xf32>
    %c127_i32_43 = arith.constant 127 : i32
    %102 = tpu.dynamic_rotate %98 by %c127_i32_43 dim 0 : vector<128x128xf32>, i32 -> vector<128x128xf32>
    %cst_44 = arith.constant 0.000000e+00 : f32
    %103 = vector.broadcast %cst_44 : f32 to vector<128x128xf32>
    %104 = arith.select %47, %102, %103 : vector<128x128xi1>, vector<128x128xf32>
    %105 = arith.truncf %101 : vector<128x128xf32> to vector<128x128xbf16>
    %cst_45 = arith.constant dense<0.000000e+00> : vector<128x128xf32>
    %106 = tpu.matmul %105, %4, %cst_45 {dimension_numbers = #tpu.dot_dimension_numbers<[1], [0], [0], [1], [0, 0, 1, 1], [], []>} : vector<128x128xbf16>, vector<128x128xbf16>, vector<128x128xf32> -> vector<128x128xf32>
    %107 = arith.truncf %98 : vector<128x128xf32> to vector<128x128xbf16>
    %cst_46 = arith.constant dense<0.000000e+00> : vector<128x128xf32>
    %108 = tpu.matmul %107, %5, %cst_46 {dimension_numbers = #tpu.dot_dimension_numbers<[1], [0], [0], [1], [0, 0, 1, 1], [], []>} : vector<128x128xbf16>, vector<128x128xbf16>, vector<128x128xf32> -> vector<128x128xf32>
    %109 = arith.addf %106, %108 : vector<128x128xf32>
    %110 = arith.truncf %104 : vector<128x128xf32> to vector<128x128xbf16>
    %cst_47 = arith.constant dense<0.000000e+00> : vector<128x128xf32>
    %111 = tpu.matmul %110, %6, %cst_47 {dimension_numbers = #tpu.dot_dimension_numbers<[1], [0], [0], [1], [0, 0, 1, 1], [], []>} : vector<128x128xbf16>, vector<128x128xbf16>, vector<128x128xf32> -> vector<128x128xf32>
    %112 = arith.addf %109, %111 : vector<128x128xf32>
    %113 = vector.broadcast %9 : vector<1x128xf32> to vector<128x128xf32>
    %114 = arith.mulf %112, %113 : vector<128x128xf32>
    %115 = vector.broadcast %10 : vector<1x128xf32> to vector<128x128xf32>
    %116 = arith.addf %114, %115 : vector<128x128xf32>
    %cst_48 = arith.constant 0.000000e+00 : f32
    %117 = vector.broadcast %cst_48 : f32 to vector<128x128xf32>
    %118 = arith.subf %117, %116 : vector<128x128xf32>
    %119 = math.exp %118 : vector<128x128xf32>
    %cst_49 = arith.constant 1.000000e+00 : f32
    %120 = vector.broadcast %cst_49 : f32 to vector<128x128xf32>
    %121 = arith.addf %120, %119 : vector<128x128xf32>
    %122 = tpu.reciprocal %121 {approx = true} : vector<128x128xf32> -> vector<128x128xf32>
    %123 = arith.mulf %116, %122 : vector<128x128xf32>
    %124 = arith.addf %123, %2 : vector<128x128xf32>
    %125 = arith.truncf %124 : vector<128x128xf32> to vector<128x128xbf16>
    %c0_50 = arith.constant 0 : index
    %c0_51 = arith.constant 0 : index
    %c0_52 = arith.constant 0 : index
    %126 = vector.load %arg10[%c0_50, %c0_51, %c0_52] : memref<1x128x128xbf16, #tpu.memory_space<vmem>>, vector<1x128x128xbf16>
    %127 = vector.shape_cast %126 : vector<1x128x128xbf16> to vector<128x128xbf16>
    %128 = vector.shape_cast %125 : vector<128x128xbf16> to vector<1x128x128xbf16>
    tpu.vector_store %arg10[%c0_50, %c0_51, %c0_52], %128 {strides = array<i32>} : memref<1x128x128xbf16, #tpu.memory_space<vmem>>, vector<1x128x128xbf16>,
    return
  }
  func.func @transform_0(%arg0: i32) -> (i32, i32, i32) {
    %c0_i32 = arith.constant 0 : i32
    %c0_i32_0 = arith.constant 0 : i32
    %c0_i32_1 = arith.constant 0 : i32
    return %arg0, %c0_i32, %c0_i32_0 : i32, i32, i32
  }
  func.func @transform_1(%arg0: i32) -> (i32, i32) {
    %c0_i32 = arith.constant 0 : i32
    %c0_i32_0 = arith.constant 0 : i32
    %c0_i32_1 = arith.constant 0 : i32
    return %c0_i32, %c0_i32_0 : i32, i32
  }
  func.func @transform_2(%arg0: i32) -> (i32, i32) {
    %c0_i32 = arith.constant 0 : i32
    %c0_i32_0 = arith.constant 0 : i32
    %c0_i32_1 = arith.constant 0 : i32
    return %c0_i32, %c0_i32_0 : i32, i32
  }
  func.func @transform_3(%arg0: i32) -> (i32, i32) {
    %c0_i32 = arith.constant 0 : i32
    %c0_i32_0 = arith.constant 0 : i32
    %c0_i32_1 = arith.constant 0 : i32
    return %c0_i32, %c0_i32_0 : i32, i32
  }
  func.func @transform_4(%arg0: i32) -> (i32, i32) {
    %c0_i32 = arith.constant 0 : i32
    %c0_i32_0 = arith.constant 0 : i32
    %c0_i32_1 = arith.constant 0 : i32
    return %c0_i32, %c0_i32_0 : i32, i32
  }
  func.func @transform_5(%arg0: i32) -> (i32, i32) {
    %c0_i32 = arith.constant 0 : i32
    %c0_i32_0 = arith.constant 0 : i32
    %c0_i32_1 = arith.constant 0 : i32
    return %c0_i32, %c0_i32_0 : i32, i32
  }
  func.func @transform_6(%arg0: i32) -> (i32, i32) {
    %c0_i32 = arith.constant 0 : i32
    %c0_i32_0 = arith.constant 0 : i32
    %c0_i32_1 = arith.constant 0 : i32
    return %c0_i32, %c0_i32_0 : i32, i32
  }
  func.func @transform_7(%arg0: i32) -> (i32, i32) {
    %c0_i32 = arith.constant 0 : i32
    %c0_i32_0 = arith.constant 0 : i32
    %c0_i32_1 = arith.constant 0 : i32
    return %c0_i32, %c0_i32_0 : i32, i32
  }
  func.func @transform_8(%arg0: i32) -> (i32, i32) {
    %c0_i32 = arith.constant 0 : i32
    %c0_i32_0 = arith.constant 0 : i32
    %c0_i32_1 = arith.constant 0 : i32
    return %c0_i32, %c0_i32_0 : i32, i32
  }
  func.func @transform_9(%arg0: i32) -> (i32, i32, i32) {
    %c0_i32 = arith.constant 0 : i32
    %c0_i32_0 = arith.constant 0 : i32
    %c0_i32_1 = arith.constant 0 : i32
    return %arg0, %c0_i32, %c0_i32_0 : i32, i32, i32
  }
}

</mosaic_0001>

<bundles_post_ra>
// kernel: res_unit_n_forward.1
= control target key start
LH: loop header
LB: loop body
LE: loop exit
PB: predicated region body
PF: predicated region fallthrough
CT: control target
= control target key end

     0   :  { %s3748_s30 = smov 0   ;;  %s4987_s0 = inlined_call_operand.vmem [shape: bf16[2,128,128], index: 0, kind: input, shape index: {}]   ;;  %s4988_s1 = inlined_call_operand.vmem [shape: bf16[128,128], index: 1, kind: input, shape index: {}]   ;;  %s4989_s2 = inlined_call_operand.vmem [shape: bf16[128,128], index: 2, kind: input, shape index: {}]   ;;  %s4990_s3 = inlined_call_operand.vmem [shape: bf16[128,128], index: 3, kind: input, shape index: {}]   ;;  %s4991_s4 = inlined_call_operand.vmem [shape: bf16[128,128], index: 4, kind: input, shape index: {}]   ;;  %s4992_s5 = inlined_call_operand.vmem [shape: f32[1,128], index: 5, kind: input, shape index: {}]   ;;  %s4993_s6 = inlined_call_operand.vmem [shape: f32[1,128], index: 6, kind: input, shape index: {}]   ;;  %s4994_s7 = inlined_call_operand.vmem [shape: f32[1,128], index: 7, kind: input, shape index: {}]   ;;  %s4995_s8 = inlined_call_operand.vmem [shape: f32[1,128], index: 8, kind: input, shape index: {}]   ;;  %s4996_s9 = inlined_call_operand.vmem [shape: bf16[2,128,128], index: 9, kind: output, shape index: {}]  }
   0x1 LB: > { %s2660_s10 = sadd.s32 4294967295, %s3695_s30   ;;  %p2664_p0 = scmp.ge.s32.totalorder %s3695_s30, 1  ;;  %s3695_s30 = sphi %s3748_s30, %s19_s30  }
   0x2   : > { %p287_p1 = scmp.lt.s32.totalorder %s3695_s30, 3 }
   0x4   : > { %p288_p2 = pnand %p2664_p0, %p287_p1 }
   0x5   : > { %v3349_v0 = vld [vmem:[%s4988_s1] sm:$0xff] (!%p288_p2)   ;;  %p323_p3 = scmp.lt.s32.totalorder (!%p288_p2), %s2660_s10, 1  ;;  %v3350_v1 = vld [vmem:[%s4988_s1 + $0x8] sm:$0xff] (!%p288_p2)   ;;  %v3351_v2 = vld [vmem:[%s4988_s1 + $0x10] sm:$0xff] (!%p288_p2)   ;;  %vm3697_vm3 = vmmov (!%p288_p2), 1  }
   0x6   : > { %291 = sbr.rel (%p288_p2) target bundleno = 1210 (0x4ba), region = 56  ;;  %3020 = vmatprep.subr.bf16.mxu1 (!%p288_p2), %v3349_v0  ;;  %3148 = vmatprep.subr.bf16.mxu0 (!%p288_p2), %v3349_v0  ;;  %v3352_v3 = vld [vmem:[%s4988_s1 + $0x18] sm:$0xff] (!%p288_p2)   ;;  %v3353_v5 = vld [vmem:[%s4988_s1 + $0x20] sm:$0xff] (!%p288_p2)   ;;  %v3354_v6 = vld [vmem:[%s4988_s1 + $0x28] sm:$0xff] (!%p288_p2)  }
   0x7   : > { %3021 = vmatpush3.bf16.msra.mxu1 (!%p288_p2), %v3349_v0  ;;  %3149 = vmatpush3.bf16.msra.mxu0 (!%p288_p2), %v3349_v0  ;;  %v3355_v7 = vld [vmem:[%s4988_s1 + $0x30] sm:$0xff] (!%p288_p2)   ;;  %v3356_v8 = vld [vmem:[%s4988_s1 + $0x38] sm:$0xff] (!%p288_p2)   ;;  %v3365_v16 = vld [vmem:[%s4990_s3] sm:$0xff] (!%p288_p2)  }
   0x8   : > { %3022 = vmatprep.subr.bf16.mxu1 (!%p288_p2), %v3350_v1  ;;  %3150 = vmatprep.subr.bf16.mxu0 (!%p288_p2), %v3350_v1  ;;  %v3366_v17 = vld [vmem:[%s4990_s3 + $0x8] sm:$0xff] (!%p288_p2)   ;;  %v3367_v18 = vld [vmem:[%s4990_s3 + $0x10] sm:$0xff] (!%p288_p2)   ;;  %v3368_v19 = vld [vmem:[%s4990_s3 + $0x18] sm:$0xff] (!%p288_p2)  }
   0x9   : > { %v3369_v20 = vld [vmem:[%s4990_s3 + $0x20] sm:$0xff] (!%p288_p2)   ;;  %v3370_v21 = vld [vmem:[%s4990_s3 + $0x28] sm:$0xff] (!%p288_p2)   ;;  %v3371_v22 = vld [vmem:[%s4990_s3 + $0x30] sm:$0xff] (!%p288_p2)  }
   0xa   : > { %v3372_v23 = vld [vmem:[%s4990_s3 + $0x38] sm:$0xff] (!%p288_p2)   ;;  %v3825_v24 = vld [vmem:[%s4989_s2] sm:$0xff] (!%p288_p2)  }
   0xb   : > { %3023 = vmatpush3.bf16.msra.mxu1 (!%p288_p2), %v3350_v1  ;;  %3151 = vmatpush3.bf16.msra.mxu0 (!%p288_p2), %v3350_v1  ;;  %v3831_v25 = vld [vmem:[%s4992_s5] ss:$0 sm:$0xff] (!%p288_p2) }
   0xc   : > { %3024 = vmatprep.subr.bf16.mxu1 (!%p288_p2), %v3351_v2  ;;  %3152 = vmatprep.subr.bf16.mxu0 (!%p288_p2), %v3351_v2  ;;  %v3836_v26 = vld [vmem:[%s4993_s6] ss:$0 sm:$0xff] (!%p288_p2) }
   0xd   : > { %s5077_s10 = smov (!%p323_p3, %s2660_s10), 1 }
   0xe   : > { %s2827_s17 = sshll.u32 %s5077_s10, 6 }
   0xf   : > { %s3773_s20 = scalar_lea.vmem %s4987_s0, %s2827_s17  ;;  %3025 = vmatpush3.bf16.msra.mxu1 %v3351_v2  ;;  %3153 = vmatpush3.bf16.msra.mxu0 %v3351_v2  ;;  %s4956_s26 = scalar_lea.vmem %s4996_s9, %s2827_s17 }
  0x10   : > { %v334_v4 = vld [vmem:[%s3773_s20] sm:$0xff]   ;;  %3026 = vmatprep.subr.bf16.mxu1 %v3352_v3  ;;  %3154 = vmatprep.subr.bf16.mxu0 %v3352_v3  ;;  %v336_v9 = vld [vmem:[%s3773_s20 + $0x8] sm:$0xff]   ;;  %v338_v10 = vld [vmem:[%s3773_s20 + $0x10] sm:$0xff]  }
  0x11   : > { %3036 = vmatprep.mubr.bf16.mxu1 %v334_v4  ;;  %v340_v11 = vld [vmem:[%s3773_s20 + $0x18] sm:$0xff]   ;;  %v342_v12 = vld [vmem:[%s3773_s20 + $0x20] sm:$0xff]   ;;  %v344_v13 = vld [vmem:[%s3773_s20 + $0x28] sm:$0xff]  }
  0x12   : > { %v346_v14 = vld [vmem:[%s3773_s20 + $0x30] sm:$0xff]   ;;  %v348_v15 = vld [vmem:[%s3773_s20 + $0x38] sm:$0xff]  }
  0x13   : > { %3027 = vmatpush3.bf16.msra.mxu1 %v3352_v3  ;;  %3155 = vmatpush3.bf16.msra.mxu0 %v3352_v3 }
  0x14   : > { %3028 = vmatprep.subr.bf16.mxu1 %v3353_v5  ;;  %3156 = vmatprep.subr.bf16.mxu0 %v3353_v5 }
  0x17   : > { %3029 = vmatpush3.bf16.msra.mxu1 %v3353_v5  ;;  %3157 = vmatpush3.bf16.msra.mxu0 %v3353_v5 }
  0x18   : > { %3030 = vmatprep.subr.bf16.mxu1 %v3354_v6  ;;  %3158 = vmatprep.subr.bf16.mxu0 %v3354_v6 }
  0x1b   : > { %3031 = vmatpush3.bf16.msra.mxu1 %v3354_v6  ;;  %3159 = vmatpush3.bf16.msra.mxu0 %v3354_v6 }
  0x1c   : > { %3032 = vmatprep.subr.bf16.mxu1 %v3355_v7  ;;  %3160 = vmatprep.subr.bf16.mxu0 %v3355_v7 }
  0x1f   : > { %3033 = vmatpush3.bf16.msra.mxu1 %v3355_v7  ;;  %3161 = vmatpush3.bf16.msra.mxu0 %v3355_v7 }
  0x20   : > { %3034 = vmatprep.subr.bf16.mxu1 %v3356_v8  ;;  %3162 = vmatprep.subr.bf16.mxu0 %v3356_v8 }
  0x23   : > { %3035 = vmatpush3.bf16.msra.mxu1 %v3356_v8  ;;  %3163 = vmatpush3.bf16.msra.mxu0 %v3356_v8 }
  0x24   : > { %3052 = vmatprep.subr.bf16.mxu1 %v3365_v16  ;;  %3180 = vmatprep.subr.bf16.mxu0 %v3365_v16 }
  0x26   : > { %3037 = vmatmul.mubr.bf16.vlgmr.msra.gmra.mrb[0].mxu1 %v336_v9 }
  0x27   : > { %3040 = vmatprep.mubr.bf16.mxu1 %v338_v10  ;;  %3053 = vmatpush3.bf16.msra.mxu1 %v3365_v16 }
  0x28   : > { %3054 = vmatprep.subr.bf16.mxu1 %v3366_v17 }
  0x2b   : > { %3055 = vmatpush3.bf16.msra.mxu1 %v3366_v17 }
  0x2c   : > { %3056 = vmatprep.subr.bf16.mxu1 %v3367_v18 }
  0x2e   : > { %3041 = vmatmul.mubr.bf16.gmra.mrb[4].mxu1 %v340_v11 }
  0x2f   : > { %3044 = vmatprep.mubr.bf16.mxu1 %v342_v12  ;;  %3057 = vmatpush3.bf16.msra.mxu1 %v3367_v18  ;;  %v434_v18 = vlaneseq }
  0x30   : > { %3058 = vmatprep.subr.bf16.mxu1 %v3368_v19 }
  0x33   : > { %3059 = vmatpush3.bf16.msra.mxu1 %v3368_v19 }
  0x34   : > { %3060 = vmatprep.subr.bf16.mxu1 %v3369_v20 }
  0x36   : > { %3045 = vmatmul.mubr.bf16.gmra.mrb[8].mxu1 %v344_v13 }
  0x37   : > { %3048 = vmatprep.mubr.bf16.mxu1 %v346_v14  ;;  %3061 = vmatpush3.bf16.msra.mxu1 %v3369_v20 }
  0x38   : > { %3062 = vmatprep.subr.bf16.mxu1 %v3370_v21 }
  0x3b   : > { %3063 = vmatpush3.bf16.msra.mxu1 %v3370_v21 }
  0x3c   : > { %3064 = vmatprep.subr.bf16.mxu1 %v3371_v22 }
  0x3e   : > { %3049 = vmatmul.mubr.bf16.gmra.mrb[12].mxu1 %v348_v15 }
  0x3f   : > { %3065 = vmatpush3.bf16.msra.mxu1 %v3371_v22 }
  0x40   : > { %3066 = vmatprep.subr.bf16.mxu1 %v3372_v23 }
  0x43   : > { %3067 = vmatpush3.bf16.msra.mxu1 %v3372_v23 }
  0x44   : > { %3084 = vmatprep.subr.bf16.mxu1 %v3825_v24 }
  0xf9   : > { %v3038_v27 = vpop.f32.mrb[0].mxu1 }
  0xfa   : > { %v876_v28 = vmul.f32 %v3038_v27, %v3831_v25  ;;  %v805_v29 = vpop.f32.mrb[1].mxu1 }
  0xfb   : > { %v874_v30 = vmul.f32 %v3831_v25, %v805_v29  ;;  %v3039_v31 = vpop.f32.mrb[2].mxu1 }
  0xfc   : > { %v3841_v32 = vadd.f32 %v3836_v26, %v876_v28  ;;  %v877_v33 = vmul.f32 %v3039_v31, %v3831_v25  ;;  %v808_v34 = vpop.f32.mrb[3].mxu1 }
  0xfd   : > { %v3845_v35 = vadd.f32 %v3836_v26, %v874_v30  ;;  %v875_v36 = vmul.f32 %v3831_v25, %v808_v34 }
  0xfe   : > { %v914_v37 = vsub.f32 0.0, %v3841_v32  ;;  %v3850_v38 = vadd.f32 %v3836_v26, %v877_v33 }
  0xff   : > { %v912_v39 = vsub.f32 0.0, %v3845_v35  ;;  %v3854_v40 = vadd.f32 %v3836_v26, %v875_v36 }
 0x100   : > { %v932_v41 = vmul.f32 1.442695, %v914_v37  ;;  %v915_v42 = vsub.f32 0.0, %v3850_v38 }
 0x101   : > { %v928_v43 = vmul.f32 1.442695, %v912_v39  ;;  %v913_v44 = vsub.f32 0.0, %v3854_v40  ;;  %v3042_v45 = vpop.f32.mrb[4].mxu1 }
 0x102   : > { %3397 = vpow2.f32 %v932_v41  ;;  %v934_v46 = vmul.f32 1.442695, %v915_v42  ;;  %v880_v47 = vmul.f32 %v3042_v45, %v3831_v25  ;;  %v821_v48 = vpop.f32.mrb[5].mxu1  ;;  %v3900_v45 = vshrl.u32 %v434_v18, 7 }
 0x103   : > { %3399 = vpow2.f32 %v928_v43  ;;  %v930_v49 = vmul.f32 1.442695, %v913_v44  ;;  %v878_v50 = vmul.f32 %v3831_v25, %v821_v48  ;;  %v3043_v51 = vpop.f32.mrb[6].mxu1 }
 0x104   : > { %3401 = vpow2.f32 %v934_v46  ;;  %v3861_v52 = vadd.f32 %v3836_v26, %v880_v47  ;;  %v881_v53 = vmul.f32 %v3043_v51, %v3831_v25  ;;  %v824_v54 = vpop.f32.mrb[7].mxu1  ;;  %vm4998_vm0 = vcmp.lt.s32.totalorder %v3900_v45, 1 }
 0x105   : > { %3403 = vpow2.f32 %v930_v49  ;;  %v3865_v55 = vadd.f32 %v3836_v26, %v878_v50  ;;  %v879_v56 = vmul.f32 %v3831_v25, %v824_v54  ;;  %vm4997_vm1 = vcmp.lt.s32.totalorder %v3900_v45, 7 }
 0x106   : > { %v918_v57 = vsub.f32 0.0, %v3861_v52  ;;  %v3870_v58 = vadd.f32 %v3836_v26, %v881_v53 }
 0x107   : > { %v916_v59 = vsub.f32 0.0, %v3865_v55  ;;  %v3874_v60 = vadd.f32 %v3836_v26, %v879_v56 }
 0x108   : > { %v940_v61 = vmul.f32 1.442695, %v918_v57  ;;  %v919_v62 = vsub.f32 0.0, %v3870_v58 }
 0x109   : > { %v936_v63 = vmul.f32 1.442695, %v916_v59  ;;  %v917_v0 = vsub.f32 0.0, %v3874_v60  ;;  %v3046_v1 = vpop.f32.mrb[8].mxu1 }
 0x10a   : > { %3405 = vpow2.f32 %v940_v61  ;;  %v942_v2 = vmul.f32 1.442695, %v919_v62  ;;  %v884_v3 = vmul.f32 %v3046_v1, %v3831_v25  ;;  %v837_v4 = vpop.f32.mrb[9].mxu1 }
 0x10b   : > { %3407 = vpow2.f32 %v936_v63  ;;  %v938_v5 = vmul.f32 1.442695, %v917_v0  ;;  %v882_v6 = vmul.f32 %v3831_v25, %v837_v4  ;;  %v3047_v7 = vpop.f32.mrb[10].mxu1 }
 0x10c   : > { %v3398_v8 = vpop.eup %3397  ;;  %3409 = vpow2.f32 %v942_v2  ;;  %v3881_v9 = vadd.f32 %v3836_v26, %v884_v3  ;;  %v885_v10 = vmul.f32 %v3047_v7, %v3831_v25  ;;  %v840_v11 = vpop.f32.mrb[11].mxu1 }
 0x10d   : > { %v3400_v12 = vpop.eup %3399  ;;  %v962_v13 = vadd.f32 1.0, %v3398_v8  ;;  %3411 = vpow2.f32 %v938_v5  ;;  %v3885_v14 = vadd.f32 %v3836_v26, %v882_v6  ;;  %v883_v15 = vmul.f32 %v3831_v25, %v840_v11 }
 0x10e   : > { %v3402_v16 = vpop.eup %3401  ;;  %v960_v17 = vadd.f32 1.0, %v3400_v12  ;;  %v922_v19 = vsub.f32 0.0, %v3881_v9  ;;  %v3890_v20 = vadd.f32 %v3836_v26, %v885_v10 }
 0x10f   : > { %v3404_v21 = vpop.eup %3403  ;;  %3413 = vrcp.f32 %v962_v13  ;;  %v963_v22 = vadd.f32 1.0, %v3402_v16  ;;  %v920_v23 = vsub.f32 0.0, %v3885_v14  ;;  %v3894_v27 = vadd.f32 %v3836_v26, %v883_v15 }
 0x110   : > { %3415 = vrcp.f32 %v960_v17  ;;  %v961_v28 = vadd.f32 1.0, %v3404_v21  ;;  %v948_v29 = vmul.f32 1.442695, %v922_v19  ;;  %v923_v30 = vsub.f32 0.0, %v3890_v20 }
 0x111   : > { %3417 = vrcp.f32 %v963_v22  ;;  %v944_v31 = vmul.f32 1.442695, %v920_v23  ;;  %v921_v33 = vsub.f32 0.0, %v3894_v27  ;;  %v3050_v34 = vpop.f32.mrb[12].mxu1 }
 0x112   : > { %3419 = vrcp.f32 %v961_v28  ;;  %v950_v36 = vmul.f32 1.442695, %v923_v30  ;;  %v888_v37 = vmul.f32 %v3050_v34, %v3831_v25  ;;  %v853_v39 = vpop.f32.mrb[13].mxu1 }
 0x113   : > { %3421 = vpow2.f32 %v948_v29  ;;  %v946_v41 = vmul.f32 1.442695, %v921_v33  ;;  %v886_v42 = vmul.f32 %v3831_v25, %v853_v39  ;;  %v3051_v43 = vpop.f32.mrb[14].mxu1 }
 0x114   : > { %v3406_v44 = vpop.eup %3405  ;;  %3423 = vpow2.f32 %v944_v31  ;;  %v3903_v46 = vadd.f32 %v3836_v26, %v888_v37  ;;  %v889_v47 = vmul.f32 %v3051_v43, %v3831_v25  ;;  %v856_v48 = vpop.f32.mrb[15].mxu1 }
 0x115   : > { %v3408_v49 = vpop.eup %3407  ;;  %v966_v50 = vadd.f32 1.0, %v3406_v44  ;;  %3425 = vpow2.f32 %v950_v36  ;;  %v3907_v51 = vadd.f32 %v3836_v26, %v886_v42  ;;  %v887_v53 = vmul.f32 %v3831_v25, %v856_v48  ;;  %v3374_v48 = vld [vmem:[%s4989_s2 + $0x8] sm:$0xff]  }
 0x116   : > { %v3410_v54 = vpop.eup %3409  ;;  %v964_v56 = vadd.f32 1.0, %v3408_v49  ;;  %3427 = vpow2.f32 %v946_v41  ;;  %v926_v57 = vsub.f32 0.0, %v3903_v46  ;;  %v3912_v59 = vadd.f32 %v3836_v26, %v889_v47 }
 0x117   : > { %v3412_v61 = vpop.eup %3411  ;;  %3429 = vrcp.f32 %v966_v50  ;;  %v967_v62 = vadd.f32 1.0, %v3410_v54  ;;  %v924_v63 = vsub.f32 0.0, %v3907_v51  ;;  %v3916_v0 = vadd.f32 %v3836_v26, %v887_v53 }
 0x118   : > { %3431 = vrcp.f32 %v964_v56  ;;  %v965_v1 = vadd.f32 1.0, %v3412_v61  ;;  %v956_v2 = vmul.f32 1.442695, %v926_v57  ;;  %v927_v25 = vsub.f32 0.0, %v3912_v59 }
 0x119   : > { %v3414_v3 = vpop.eup %3413  ;;  %3433 = vrcp.f32 %v967_v62  ;;  %v952_v4 = vmul.f32 1.442695, %v924_v63  ;;  %v925_v5 = vsub.f32 0.0, %v3916_v0 }
 0x11a   : > { %v3416_v6 = vpop.eup %3415  ;;  %v994_v7 = vmul.f32 %v3414_v3, %v3841_v32  ;;  %3435 = vrcp.f32 %v965_v1  ;;  %v958_v8 = vmul.f32 1.442695, %v927_v25 }
 0x11b   : > { %v3418_v10 = vpop.eup %3417  ;;  %v3923_v26 = vmul.f32 %v3416_v6, %v3845_v35  ;;  %3437 = vpow2.f32 %v956_v2  ;;  %v954_v11 = vmul.f32 1.442695, %v925_v5  ;;  %v3375_v6 = vld [vmem:[%s4989_s2 + $0x10] sm:$0xff]  }
 0x11c   : > { %v3420_v12 = vpop.eup %3419  ;;  %v1010_v13 = vrot.slane %v994_v7, 7  ;;  %v1059_v15 = vrot.slane %v994_v7, 1  ;;  %v3927_v16 = vmul.f32 %v3418_v10, %v3850_v38  ;;  %3439 = vpow2.f32 %v952_v4 }
 0x11d   : > { %v3422_v32 = vpop.eup %3421  ;;  %v1008_v17 = vrot.slane %v3923_v26, 7  ;;  %v1057_v18 = vrot.slane %v3923_v26, 1  ;;  %v993_v19 = vmul.f32 %v3420_v12, %v3854_v40  ;;  %3441 = vpow2.f32 %v958_v8 }
 0x11e   : > { %v3424_v35 = vpop.eup %3423  ;;  %v1011_v21 = vrot.slane %v3927_v16, 7  ;;  %v1060_v22 = vrot.slane %v3927_v16, 1  ;;  %v1115_v23 = vpack.c.bf16 %v3927_v16, %v994_v7  ;;  %v970_v28 = vadd.f32 1.0, %v3422_v32 }
 0x11f   : > { %v3426_v29 = vpop.eup %3425  ;;  %v1009_v38 = vrot.slane %v993_v19, 7  ;;  %v1058_v30 = vrot.slane %v993_v19, 1  ;;  %v968_v31 = vadd.f32 1.0, %v3424_v35  ;;  %3443 = vpow2.f32 %v954_v11 }
 0x120   : > { %v3428_v33 = vpop.eup %3427  ;;  %v3939_v40 = vsel %vm4998_vm0, %v1010_v13, %v1011_v21  ;;  %v3943_v34 = vsel %vm4997_vm1, %v1059_v15, %v1060_v22  ;;  %3445 = vrcp.f32 %v970_v28  ;;  %v971_v36 = vadd.f32 1.0, %v3426_v29  ;;  %v3376_v29 = vld [vmem:[%s4989_s2 + $0x18] sm:$0xff]  }
 0x121   : > { %v3430_v37 = vpop.eup %3429  ;;  %v3947_v39 = vsel %vm4998_vm0, %v1009_v38, %v1010_v13  ;;  %3447 = vrcp.f32 %v968_v31  ;;  %v969_v41 = vadd.f32 1.0, %v3428_v33  ;;  %v1114_v42 = vpack.c.bf16 %v993_v19, %v3923_v26 }
 0x122   : > { %v3432_v43 = vpop.eup %3431  ;;  %v2707_v44 = vpack.c.bf16 %v3939_v40, %v3947_v39  ;;  %v3953_v47 = vmul.f32 %v3430_v37, %v3861_v52  ;;  %3449 = vrcp.f32 %v971_v36  ;;  %v3962_v49 = vsel %vm4998_vm0, %v1008_v17, %v1009_v38  ;;  %v3676_v39 = vld [vmem:[%s4991_s4 + $0x28] sm:$0xff]  }
 0x123   : > { %v3434_v50 = vpop.eup %3433  ;;  %v996_v53 = vmul.f32 %v3432_v43, %v3865_v55  ;;  %3451 = vrcp.f32 %v969_v41  ;;  %3068 = vmatprep.mubr.bf16.mxu1 %v1114_v42  ;;  %v3967_v52 = vsel %vm4997_vm1, %v1058_v30, %v1059_v15  ;;  %v3973_v54 = vsel %vm4997_vm1, %v1057_v18, %v1058_v30 }
 0x124   : > { %v3436_v56 = vpop.eup %3435  ;;  %v1014_v57 = vrot.slane %v3953_v47, 7  ;;  %v3977_v61 = vmul.f32 %v3434_v50, %v3870_v58  ;;  %3069 = vmatmul.mubr.bf16.vlgmr.msra.gmra.mrb[16].mxu1 %v1115_v23  ;;  %v2736_v55 = vpack.c.bf16 %v3967_v52, %v3973_v54  ;;  %v1063_v63 = vrot.slane %v3953_v47, 1 }
 0x125   : > { %v3438_v62 = vpop.eup %3437  ;;  %v1012_v1 = vrot.slane %v996_v53, 7  ;;  %v1061_v2 = vrot.slane %v996_v53, 1  ;;  %v997_v25 = vmul.f32 %v3436_v56, %v3874_v60  ;;  %3085 = vmatpush3.bf16.msra.mxu1 %v3825_v24  ;;  %v443_v26 = vadd.s32 64, %v3900_v45 }
 0x126   : > { %v3440_v3 = vpop.eup %3439  ;;  %v1015_v4 = vrot.slane %v3977_v61, 7  ;;  %v1064_v5 = vrot.slane %v3977_v61, 1  ;;  %v974_v58 = vadd.f32 1.0, %v3438_v62  ;;  %3086 = vmatprep.subr.bf16.mxu1 %v3374_v48  ;;  %v1117_v7 = vpack.c.bf16 %v3977_v61, %v3953_v47 }
 0x127   : > { %v3442_v8 = vpop.eup %3441  ;;  %v3993_v60 = vsel %vm4997_vm1, %v1060_v22, %v1061_v2  ;;  %v1013_v24 = vrot.slane %v997_v25, 7  ;;  %v1062_v10 = vrot.slane %v997_v25, 1  ;;  %v972_v11 = vadd.f32 1.0, %v3440_v3 }
 0x128   : > { %v2739_v12 = vpack.c.bf16 %v3993_v60, %v3943_v34  ;;  %3453 = vrcp.f32 %v974_v58  ;;  %v975_v13 = vadd.f32 1.0, %v3442_v8  ;;  %v1116_v15 = vpack.c.bf16 %v997_v25, %v996_v53 }
 0x129   : > { %v3444_v32 = vpop.eup %3443  ;;  %3455 = vrcp.f32 %v972_v11  ;;  %3087 = vmatpush3.bf16.msra.mxu1 %v3374_v48  ;;  %v3999_v19 = vsel %vm4998_vm0, %v1012_v1, %v1013_v24  ;;  %v4005_v35 = vsel %vm4998_vm0, %v1011_v21, %v1012_v1  ;;  %v4009_v22 = vsel %vm4998_vm0, %v1014_v57, %v1015_v4 }
 0x12a   : > { %v3446_v23 = vpop.eup %3445  ;;  %3457 = vrcp.f32 %v975_v13  ;;  %v973_v28 = vadd.f32 1.0, %v3444_v32  ;;  %3072 = vmatprep.mubr.bf16.mxu1 %v1116_v15  ;;  %3088 = vmatprep.subr.bf16.mxu1 %v3375_v6  ;;  %v2710_v16 = vpack.c.bf16 %v3999_v19, %v4005_v35  ;;  %v4018_v21 = vsel %vm4998_vm0, %v1013_v24, %v1014_v57  ;;  %v3377_v57 = vld [vmem:[%s4989_s2 + $0x20] sm:$0xff]   ;;  %v3384_v19 = vld [vmem:[%s4991_s4 + $0x18] sm:$0xff]  }
 0x12b   : > { %v3448_v38 = vpop.eup %3447  ;;  %v1002_v30 = vmul.f32 %v3446_v23, %v3881_v9  ;;  %v2713_v31 = vpack.c.bf16 %v4009_v22, %v4018_v21  ;;  %v4025_v33 = vsel %vm4997_vm1, %v1062_v10, %v1063_v63  ;;  %v4029_v36 = vsel %vm4997_vm1, %v1061_v2, %v1062_v10 }
 0x12c   : > { %v3450_v37 = vpop.eup %3449  ;;  %v1000_v41 = vmul.f32 %v3448_v38, %v3885_v14  ;;  %3459 = vrcp.f32 %v973_v28  ;;  %3073 = vmatmul.mubr.bf16.gmra.mrb[20].mxu1 %v1117_v7  ;;  %v2742_v42 = vpack.c.bf16 %v4025_v33, %v4029_v36  ;;  %v4036_v9 = vsel %vm4997_vm1, %v1063_v63, %v1064_v5  ;;  %v4865_v36 = vld [vmem:[%s4995_s8] ss:$0 sm:$0xff] }
 0x12d   : > { %v3452_v43 = vpop.eup %3451  ;;  %v1003_v47 = vmul.f32 %v3450_v37, %v3890_v20  ;;  %3089 = vmatpush3.bf16.msra.mxu1 %v3375_v6  ;;  %v455_v48 = vand.u32 15, %v3900_v45  ;;  %v1018_v50 = vrot.slane %v1002_v30, 7  ;;  %v1067_v61 = vrot.slane %v1002_v30, 1 }
 0x12e   : > { %v1016_v53 = vrot.slane %v1000_v41, 7  ;;  %v1065_v56 = vrot.slane %v1000_v41, 1  ;;  %v1001_v14 = vmul.f32 %v3452_v43, %v3894_v27  ;;  %3090 = vmatprep.subr.bf16.mxu1 %v3376_v29  ;;  %v4049_v58 = vadd.s32 16, %v3900_v45 }
 0x12f   : > { %v1019_v62 = vrot.slane %v1003_v47, 7  ;;  %v1068_v63 = vrot.slane %v1003_v47, 1  ;;  %v1119_v1 = vpack.c.bf16 %v1003_v47, %v1002_v30  ;;  %v439_v24 = vadd.s32 32, %v3900_v45 }
 0x130   : > { %v1017_v2 = vrot.slane %v1001_v14, 7  ;;  %v1066_v25 = vrot.slane %v1001_v14, 1  ;;  %v1118_v20 = vpack.c.bf16 %v1001_v14, %v1000_v41  ;;  %v4046_v3 = vsel %vm4998_vm0, %v1015_v4, %v1016_v53  ;;  %v3378_v4 = vld [vmem:[%s4989_s2 + $0x28] sm:$0xff]  }
 0x131   : > { %3091 = vmatpush3.bf16.msra.mxu1 %v3376_v29  ;;  %v4053_v27 = vsel %vm4998_vm0, %v1018_v50, %v1019_v62  ;;  %v4057_v6 = vsel %vm4997_vm1, %v1064_v5, %v1065_v56  ;;  %v4061_v7 = vsel %vm4997_vm1, %v1067_v61, %v1068_v63  ;;  %vm4092_vm2 = vcmp.ne.s32.totalorder %v455_v48, 0 }
 0x132   : > { %v3454_v8 = vpop.eup %3453  ;;  %3076 = vmatprep.mubr.bf16.mxu1 %v1118_v20  ;;  %3092 = vmatprep.subr.bf16.mxu1 %v3377_v57  ;;  %v4069_v10 = vsel %vm4998_vm0, %v1016_v53, %v1017_v2  ;;  %v4073_v5 = vsel %vm4998_vm0, %v1017_v2, %v1018_v50  ;;  %v2745_v11 = vpack.c.bf16 %v4057_v6, %v4036_v9  ;;  %v469_v53 = vand.u32 15, %v4049_v58  ;;  %vm4118_vm4 = vmpackc.low %vm3697_vm3, %vm4092_vm2 }
 0x133   : > { %v3456_v13 = vpop.eup %3455  ;;  %v2716_v15 = vpack.c.bf16 %v4069_v10, %v4046_v3  ;;  %v2719_v32 = vpack.c.bf16 %v4053_v27, %v4073_v5  ;;  %v4083_v23 = vsel %vm4997_vm1, %v1066_v25, %v1067_v61  ;;  %v1006_v29 = vmul.f32 %v3454_v8, %v3903_v46  ;;  %v3386_v3 = vld [vmem:[%s4991_s4 + $0x28] sm:$0xff]  }
 0x134   : > { %v3458_v28 = vpop.eup %3457  ;;  %v1004_v38 = vmul.f32 %v3456_v13, %v3907_v51  ;;  %3077 = vmatmul.mubr.bf16.gmra.mrb[24].mxu1 %v1119_v1  ;;  %v4089_v30 = vsel %vm4997_vm1, %v1065_v56, %v1066_v25  ;;  %v3379_v51 = vld [vmem:[%s4989_s2 + $0x30] sm:$0xff]   ;;  %v483_v56 = vand.u32 15, %v439_v24  ;;  %vm645_vm5 = vcmp.ne.s32.totalorder %v469_v53, 0  ;;  %v3382_v53 = vld [vmem:[%s4991_s4 + $0x8] sm:$0xff]  }
 0x135   : > { %v1007_v37 = vmul.f32 %v3458_v28, %v3912_v59  ;;  %3093 = vmatpush3.bf16.msra.mxu1 %v3377_v57  ;;  %v2748_v43 = vpack.c.bf16 %v4083_v23, %v4089_v30  ;;  %v1022_v61 = vrot.slane %v1006_v29, 7  ;;  %v1071_v1 = vrot.slane %v1006_v29, 1  ;;  %vm4171_vm7 = vmpackc.low %vm3697_vm3, %vm645_vm5 }
 0x136   : > { %v3460_v47 = vpop.eup %3459  ;;  %v1020_v50 = vrot.slane %v1004_v38, 7  ;;  %v1069_v46 = vrot.slane %v1004_v38, 1  ;;  %3094 = vmatprep.subr.bf16.mxu1 %v3378_v4  ;;  %vm647_vm6 = vcmp.ne.s32.totalorder %v483_v56, 0  ;;  %v511_v56 = vand.u32 15, %v443_v26 }
 0x137   : > { %v1023_v59 = vrot.slane %v1007_v37, 7  ;;  %v1072_v14 = vrot.slane %v1007_v37, 1  ;;  %v1005_v48 = vmul.f32 %v3460_v47, %v3916_v0  ;;  %v1121_v57 = vpack.c.bf16 %v1007_v37, %v1006_v29  ;;  %vm4176_vm8 = vmpackc.low %vm3697_vm3, %vm647_vm6 }
 0x138   : > { %v4105_v2 = vsel %vm4998_vm0, %v1019_v62, %v1020_v50  ;;  %v4109_v25 = vsel %vm4997_vm1, %v1068_v63, %v1069_v46  ;;  %vm651_vm10 = vcmp.ne.s32.totalorder %v511_v56, 0  ;;  %v447_v40 = vadd.s32 96, %v3900_v45  ;;  %v3673_v62 = vld [vmem:[%s4991_s4 + $0x10] sm:$0xff]  }
 0x139   : > { %v1021_v20 = vrot.slane %v1005_v48, 7  ;;  %v1070_v8 = vrot.slane %v1005_v48, 1  ;;  %3095 = vmatpush3.bf16.msra.mxu1 %v3378_v4  ;;  %v1120_v58 = vpack.c.bf16 %v1005_v48, %v1004_v38  ;;  %v1040_v0 = vsel %vm4998_vm0, %v1023_v59, %v1008_v17  ;;  %v3380_v4 = vld [vmem:[%s4989_s2 + $0x38] sm:$0xff]   ;;  %vm4204_vm12 = vmpackc.low %vm3697_vm3, %vm651_vm10 }
 0x13a   : > { %3096 = vmatprep.subr.bf16.mxu1 %v3379_v51  ;;  %v2704_v63 = vpack.c.bf16 %v3962_v49, %v1040_v0  ;;  %v4128_v24 = vsel %vm4998_vm0, %v1022_v61, %v1023_v59  ;;  %v2751_v17 = vpack.c.bf16 %v4109_v25, %v4061_v7  ;;  %v4134_v13 = vsel %vm4997_vm1, %v1071_v1, %v1072_v14  ;;  %v3381_v59 = vld [vmem:[%s4991_s4] sm:$0xff]  }
 0x13b   : > { %3080 = vmatprep.mubr.bf16.mxu1 %v1120_v58  ;;  %v1027_v28 = vsel %vm4998_vm0, %v1020_v50, %v1021_v20  ;;  %v4140_v49 = vsel %vm4998_vm0, %v1021_v20, %v1022_v61  ;;  %v4144_v29 = vsel %vm4997_vm1, %v1070_v8, %v1071_v1  ;;  %v4148_v38 = vsel %vm4997_vm1, %v1069_v46, %v1070_v8  ;;  %v3385_v1 = vld [vmem:[%s4991_s4 + $0x20] sm:$0xff]   ;;  %v3387_v20 = vld [vmem:[%s4991_s4 + $0x30] sm:$0xff]  }
 0x13c   : > { %3081 = vmatmul.mubr.bf16.gmra.mrb[28].mxu1 %v1121_v57  ;;  %v2722_v37 = vpack.c.bf16 %v1027_v28, %v4105_v2  ;;  %v2725_v41 = vpack.c.bf16 %v4128_v24, %v4140_v49  ;;  %v2754_v47 = vpack.c.bf16 %v4144_v29, %v4148_v38  ;;  %v4159_v50 = vsel %vm4997_vm1, %v1072_v14, %v1057_v18  ;;  %v3383_v57 = vld [vmem:[%s4991_s4 + $0x10] sm:$0xff]   ;;  %v4352_v7 = vld [vmem:[%s4994_s7] ss:$0 sm:$0xff] }
 0x13d   : > { %3097 = vmatpush3.bf16.msra.mxu1 %v3379_v51  ;;  %3100 = vmatprep.mubr.msk.bf16.mxu1 %vm4118_vm4, %v2704_v63  ;;  %v2757_v46 = vpack.c.bf16 %v4159_v50, %v4134_v13  ;;  %v441_v48 = vadd.s32 48, %v3900_v45  ;;  %v445_v61 = vadd.s32 80, %v3900_v45  ;;  %v449_v2 = vadd.s32 112, %v3900_v45  ;;  %v3674_v51 = vld [vmem:[%s4991_s4 + $0x18] sm:$0xff]  }
 0x13e   : > { %3098 = vmatprep.subr.bf16.mxu1 %v3380_v4  ;;  %v436_v22 = vadd.s32 8, %v3900_v45  ;;  %v438_v8 = vadd.s32 24, %v3900_v45  ;;  %v440_v58 = vadd.s32 40, %v3900_v45  ;;  %v444_v28 = vadd.s32 72, %v3900_v45 }
 0x13f   : > { %v497_v14 = vand.u32 15, %v441_v48  ;;  %v525_v35 = vand.u32 15, %v445_v61  ;;  %v553_v10 = vand.u32 15, %v449_v2  ;;  %v5024_v24 = vmov 0 }
 0x140   : > { %v476_v0 = vand.u32 15, %v438_v8  ;;  %v490_v63 = vand.u32 15, %v440_v58  ;;  %v5026_v49 = vmov 0  ;;  %v518_v54 = vand.u32 15, %v444_v28 }
 0x141   : > { %3099 = vmatpush3.bf16.msra.mxu1 %v3380_v4  ;;  %vm649_vm9 = vcmp.ne.s32.totalorder %v497_v14, 0  ;;  %vm653_vm13 = vcmp.ne.s32.totalorder %v525_v35, 0  ;;  %vm657_vm5 = vcmp.ne.s32.totalorder %v553_v10, 0  ;;  %v442_v4 = vadd.s32 56, %v3900_v45 }
 0x142   : > { %3116 = vmatprep.subr.bf16.mxu1 %v3381_v59  ;;  %vm4199_vm11 = vmpackc.low %vm3697_vm3, %vm649_vm9  ;;  %v5030_v34 = vmov 0  ;;  %v450_v33 = vadd.s32 120, %v3900_v45  ;;  %v5036_v6 = vmov 0 }
 0x143   : > { %vm4227_vm15 = vmpackc.low %vm3697_vm3, %vm653_vm13  ;;  %vm662_vm13 = vcmp.ne.s32.totalorder %v476_v0, 15  ;;  %v504_v52 = vand.u32 15, %v442_v4 }
 0x144   : > { %3101 = vmatmul.mubr.msk.bf16.vlgmr.msra.gmra.mrb[16].mxu1 %vm4171_vm7, %v2707_v44  ;;  %vm4252_vm9 = vmpackc.low %vm3697_vm3, %vm657_vm5  ;;  %v560_v9 = vand.u32 15, %v450_v33  ;;  %v3677_v44 = vld [vmem:[%s4991_s4 + $0x30] sm:$0xff]  }
 0x145   : > { %3117 = vmatpush3.bf16.msra.mxu1 %v3381_v59  ;;  %3104 = vmatprep.mubr.msk.bf16.mxu1 %vm4176_vm8, %v2710_v16  ;;  %v539_v16 = vand.u32 15, %v447_v40  ;;  %vm4277_vm5 = vmpackc.low %vm662_vm13, %vm3697_vm3  ;;  %vm666_vm13 = vcmp.ne.s32.totalorder %v504_v52, 15 }
 0x146   : > { %3118 = vmatprep.subr.bf16.mxu1 %v3382_v53  ;;  %v5025_v24 = vsel %vm4277_vm5, 4294967295, %v5024_v24  ;;  %vm4299_vm1 = vmpackc.low %vm666_vm13, %vm3697_vm3 }
 0x147   : > { %vm655_vm14 = vcmp.ne.s32.totalorder %v539_v16, 0 }
 0x148   : > { %vm4232_vm2 = vmpackc.low %vm3697_vm3, %vm655_vm14  ;;  %vm664_vm14 = vcmp.ne.s32.totalorder %v490_v63, 15 }
 0x149   : > { %3119 = vmatpush3.bf16.msra.mxu1 %v3382_v53 }
 0x14a   : > { %3120 = vmatprep.subr.bf16.mxu1 %v3383_v57 }
 0x14c   : > { %3105 = vmatmul.mubr.msk.bf16.gmra.mrb[20].mxu1 %vm4199_vm11, %v2713_v31  ;;  %v3678_v31 = vld [vmem:[%s4991_s4 + $0x38] sm:$0xff]  }
 0x14d   : > { %3121 = vmatpush3.bf16.msra.mxu1 %v3383_v57  ;;  %3108 = vmatprep.mubr.msk.bf16.mxu1 %vm4204_vm12, %v2716_v15  ;;  %v462_v15 = vand.u32 15, %v436_v22 }
 0x14e   : > { %3122 = vmatprep.subr.bf16.mxu1 %v3384_v19 }
 0x14f   : > { %vm660_vm6 = vcmp.ne.s32.totalorder %v462_v15, 15 }
 0x150   : > { %vm4257_vm10 = vmpackc.low %vm660_vm6, %vm3697_vm3 }
 0x151   : > { %3123 = vmatpush3.bf16.msra.mxu1 %v3384_v19  ;;  %vm4282_vm6 = vmpackc.low %vm664_vm14, %vm3697_vm3  ;;  %vm668_vm14 = vcmp.ne.s32.totalorder %v518_v54, 15 }
 0x152   : > { %3124 = vmatprep.subr.bf16.mxu1 %v3385_v1  ;;  %v5027_v49 = vsel %vm4282_vm6, 4294967295, %v5026_v49  ;;  %vm4304_vm0 = vmpackc.low %vm668_vm14, %vm3697_vm3 }
 0x153   : > { %v5031_v34 = vsel %vm4304_vm0, 4294967295, %v5030_v34 }
 0x154   : > { %3109 = vmatmul.mubr.msk.bf16.gmra.mrb[24].mxu1 %vm4227_vm15, %v2719_v32  ;;  %v3388_v32 = vld [vmem:[%s4991_s4 + $0x38] sm:$0xff]  }
 0x155   : > { %3125 = vmatpush3.bf16.msra.mxu1 %v3385_v1  ;;  %3112 = vmatprep.mubr.msk.bf16.mxu1 %vm4232_vm2, %v2722_v37  ;;  %v448_v37 = vadd.s32 104, %v3900_v45 }
 0x156   : > { %3126 = vmatprep.subr.bf16.mxu1 %v3386_v3 }
 0x159   : > { %3127 = vmatpush3.bf16.msra.mxu1 %v3386_v3 }
 0x15a   : > { %3128 = vmatprep.subr.bf16.mxu1 %v3387_v20 }
 0x15c   : > { %3113 = vmatmul.mubr.msk.bf16.gmra.mrb[28].mxu1 %vm4252_vm9, %v2725_v41 }
 0x15d   : > { %3129 = vmatpush3.bf16.msra.mxu1 %v3387_v20  ;;  %3132 = vmatprep.mubr.msk.bf16.mxu1 %vm4257_vm10, %v2736_v55  ;;  %v446_v55 = vadd.s32 88, %v3900_v45 }
 0x15e   : > { %3130 = vmatprep.subr.bf16.mxu1 %v3388_v32 }
 0x15f   : > { %v532_v60 = vand.u32 15, %v446_v55 }
 0x161   : > { %3131 = vmatpush3.bf16.msra.mxu1 %v3388_v32  ;;  %vm670_vm13 = vcmp.ne.s32.totalorder %v532_v60, 15 }
 0x164   : > { %3133 = vmatmul.mubr.msk.bf16.vlgmr.msra.gmra.mrb[16].mxu1 %vm4277_vm5, %v2739_v12  ;;  %v546_v12 = vand.u32 15, %v448_v37 }
 0x165   : > { %3136 = vmatprep.mubr.msk.bf16.mxu1 %vm4282_vm6, %v2742_v42  ;;  %vm4320_vm6 = vmpackc.low %vm670_vm13, %vm3697_vm3  ;;  %v5034_v42 = vmov 0  ;;  %vm674_vm13 = vcmp.ne.s32.totalorder %v560_v9, 15 }
 0x166   : > { %vm672_vm14 = vcmp.ne.s32.totalorder %v546_v12, 15 }
 0x167   : > { %vm4325_vm5 = vmpackc.low %vm672_vm14, %vm3697_vm3  ;;  %vm5039_vm14 = vcmp.lt.s32.totalorder %v3900_v45, 7 }
 0x168   : > { %v5035_v42 = vsel %vm4325_vm5, 4294967295, %v5034_v42 }
 0x16c   : > { %3137 = vmatmul.mubr.msk.bf16.gmra.mrb[20].mxu1 %vm4299_vm1, %v2745_v11  ;;  %v4357_v11 = vld [vmem:[%s4995_s8] ss:$0 sm:$0xff] }
 0x16d   : > { %3140 = vmatprep.mubr.msk.bf16.mxu1 %vm4304_vm0, %v2748_v43  ;;  %vm4340_vm0 = vmpackc.low %vm674_vm13, %vm3697_vm3  ;;  %vm5038_vm3 = vcmp.lt.s32.totalorder %v3900_v45, 1 }
 0x16e   : > { %v5037_v6 = vsel %vm4340_vm0, 4294967295, %v5036_v6  ;;  %vm5040_vm13 = vmmov %vm5038_vm3 }
 0x174   : > { %3141 = vmatmul.mubr.msk.bf16.gmra.mrb[24].mxu1 %vm4320_vm6, %v2751_v17 }
 0x175   : > { %3144 = vmatprep.mubr.msk.bf16.mxu1 %vm4325_vm5, %v2754_v47 }
 0x17c   : > { %3145 = vmatmul.mubr.msk.bf16.gmra.mrb[28].mxu1 %vm4340_vm0, %v2757_v46 }
 0x237   : > { %v3134_v23 = vpop.f32.mrb[16].mxu1 }
 0x238   : > { %v1589_v30 = vmul.f32 %v3134_v23, %v4352_v7  ;;  %v1502_v43 = vpop.f32.mrb[17].mxu1 }
 0x239   : > { %v1587_v25 = vmul.f32 %v4352_v7, %v1502_v43  ;;  %v3135_v17 = vpop.f32.mrb[18].mxu1 }
 0x23a   : > { %v4362_v13 = vadd.f32 %v4357_v11, %v1589_v30  ;;  %v1590_v29 = vmul.f32 %v3135_v17, %v4352_v7  ;;  %v1505_v38 = vpop.f32.mrb[19].mxu1 }
 0x23b   : > { %v4366_v47 = vadd.f32 %v4357_v11, %v1587_v25  ;;  %v1588_v50 = vmul.f32 %v4352_v7, %v1505_v38 }
 0x23c   : > { %v1627_v46 = vsub.f32 0.0, %v4362_v13  ;;  %v4371_v59 = vadd.f32 %v4357_v11, %v1590_v29 }
 0x23d   : > { %v1625_v48 = vsub.f32 0.0, %v4366_v47  ;;  %v4375_v26 = vadd.f32 %v4357_v11, %v1588_v50 }
 0x23e   : > { %v1645_v53 = vmul.f32 1.442695, %v1627_v46  ;;  %v1628_v14 = vsub.f32 0.0, %v4371_v59 }
 0x23f   : > { %v1641_v56 = vmul.f32 1.442695, %v1625_v48  ;;  %v1626_v57 = vsub.f32 0.0, %v4375_v26  ;;  %v3138_v61 = vpop.f32.mrb[20].mxu1 }
 0x240   : > { %3461 = vpow2.f32 %v1645_v53  ;;  %v1647_v40 = vmul.f32 1.442695, %v1628_v14  ;;  %v1593_v19 = vmul.f32 %v3138_v61, %v4352_v7  ;;  %v1518_v35 = vpop.f32.mrb[21].mxu1 }
 0x241   : > { %3463 = vpow2.f32 %v1641_v56  ;;  %v1643_v16 = vmul.f32 1.442695, %v1626_v57  ;;  %v1591_v1 = vmul.f32 %v4352_v7, %v1518_v35  ;;  %v3139_v2 = vpop.f32.mrb[22].mxu1 }
 0x242   : > { %3465 = vpow2.f32 %v1647_v40  ;;  %v4382_v22 = vadd.f32 %v4357_v11, %v1593_v19  ;;  %v1594_v3 = vmul.f32 %v3139_v2, %v4352_v7  ;;  %v1521_v10 = vpop.f32.mrb[23].mxu1 }
 0x243   : > { %3467 = vpow2.f32 %v1643_v16  ;;  %v4386_v15 = vadd.f32 %v4357_v11, %v1591_v1  ;;  %v1592_v20 = vmul.f32 %v4352_v7, %v1521_v10 }
 0x244   : > { %v1631_v8 = vsub.f32 0.0, %v4382_v22  ;;  %v4391_v58 = vadd.f32 %v4357_v11, %v1594_v3 }
 0x245   : > { %v1629_v32 = vsub.f32 0.0, %v4386_v15  ;;  %v4395_v0 = vadd.f32 %v4357_v11, %v1592_v20 }
 0x246   : > { %v1653_v63 = vmul.f32 1.442695, %v1631_v8  ;;  %v1632_v4 = vsub.f32 0.0, %v4391_v58 }
 0x247   : > { %v1649_v28 = vmul.f32 1.442695, %v1629_v32  ;;  %v1630_v52 = vsub.f32 0.0, %v4395_v0  ;;  %v3142_v54 = vpop.f32.mrb[24].mxu1 }
 0x248   : > { %3469 = vpow2.f32 %v1653_v63  ;;  %v1655_v55 = vmul.f32 1.442695, %v1632_v4  ;;  %v1597_v37 = vmul.f32 %v3142_v54, %v4352_v7  ;;  %v1534_v60 = vpop.f32.mrb[25].mxu1 }
 0x249   : > { %3471 = vpow2.f32 %v1649_v28  ;;  %v1651_v12 = vmul.f32 1.442695, %v1630_v52  ;;  %v1595_v33 = vmul.f32 %v4352_v7, %v1534_v60  ;;  %v3143_v9 = vpop.f32.mrb[26].mxu1 }
 0x24a   : > { %v3462_v23 = vpop.eup %3461  ;;  %3473 = vpow2.f32 %v1655_v55  ;;  %v4402_v30 = vadd.f32 %v4357_v11, %v1597_v37  ;;  %v1598_v43 = vmul.f32 %v3143_v9, %v4352_v7  ;;  %v1537_v25 = vpop.f32.mrb[27].mxu1 }
 0x24b   : > { %v3464_v17 = vpop.eup %3463  ;;  %v1675_v29 = vadd.f32 1.0, %v3462_v23  ;;  %3475 = vpow2.f32 %v1651_v12  ;;  %v4406_v38 = vadd.f32 %v4357_v11, %v1595_v33  ;;  %v1596_v50 = vmul.f32 %v4352_v7, %v1537_v25 }
 0x24c   : > { %v3466_v46 = vpop.eup %3465  ;;  %v1673_v48 = vadd.f32 1.0, %v3464_v17  ;;  %v1635_v53 = vsub.f32 0.0, %v4402_v30  ;;  %v4411_v14 = vadd.f32 %v4357_v11, %v1598_v43 }
 0x24d   : > { %v3468_v56 = vpop.eup %3467  ;;  %3477 = vrcp.f32 %v1675_v29  ;;  %v1676_v57 = vadd.f32 1.0, %v3466_v46  ;;  %v1633_v61 = vsub.f32 0.0, %v4406_v38  ;;  %v4415_v40 = vadd.f32 %v4357_v11, %v1596_v50 }
 0x24e   : > { %3479 = vrcp.f32 %v1673_v48  ;;  %v1674_v19 = vadd.f32 1.0, %v3468_v56  ;;  %v1661_v35 = vmul.f32 1.442695, %v1635_v53  ;;  %v1636_v16 = vsub.f32 0.0, %v4411_v14 }
 0x24f   : > { %3481 = vrcp.f32 %v1676_v57  ;;  %v1657_v1 = vmul.f32 1.442695, %v1633_v61  ;;  %v1634_v2 = vsub.f32 0.0, %v4415_v40  ;;  %v3146_v3 = vpop.f32.mrb[28].mxu1 }
 0x250   : > { %3483 = vrcp.f32 %v1674_v19  ;;  %v1663_v10 = vmul.f32 1.442695, %v1636_v16  ;;  %v1601_v20 = vmul.f32 %v3146_v3, %v4352_v7  ;;  %v1550_v8 = vpop.f32.mrb[29].mxu1 }
 0x251   : > { %3485 = vpow2.f32 %v1661_v35  ;;  %v1659_v32 = vmul.f32 1.442695, %v1634_v2  ;;  %v1599_v63 = vmul.f32 %v4352_v7, %v1550_v8  ;;  %v3147_v4 = vpop.f32.mrb[30].mxu1 }
 0x252   : > { %v3470_v28 = vpop.eup %3469  ;;  %3487 = vpow2.f32 %v1657_v1  ;;  %v4422_v52 = vadd.f32 %v4357_v11, %v1601_v20  ;;  %v1602_v54 = vmul.f32 %v3147_v4, %v4352_v7  ;;  %v1553_v55 = vpop.f32.mrb[31].mxu1 }
 0x253   : > { %v3472_v37 = vpop.eup %3471  ;;  %v1679_v60 = vadd.f32 1.0, %v3470_v28  ;;  %3489 = vpow2.f32 %v1663_v10  ;;  %v4426_v12 = vadd.f32 %v4357_v11, %v1599_v63  ;;  %v1600_v33 = vmul.f32 %v4352_v7, %v1553_v55 }
 0x254   : > { %v3474_v9 = vpop.eup %3473  ;;  %v1677_v23 = vadd.f32 1.0, %v3472_v37  ;;  %3491 = vpow2.f32 %v1659_v32  ;;  %v1639_v43 = vsub.f32 0.0, %v4422_v52  ;;  %v4431_v25 = vadd.f32 %v4357_v11, %v1602_v54 }
 0x255   : > { %v3476_v17 = vpop.eup %3475  ;;  %3493 = vrcp.f32 %v1679_v60  ;;  %v1680_v29 = vadd.f32 1.0, %v3474_v9  ;;  %v1637_v50 = vsub.f32 0.0, %v4426_v12  ;;  %v4435_v46 = vadd.f32 %v4357_v11, %v1600_v33 }
 0x256   : > { %3495 = vrcp.f32 %v1677_v23  ;;  %v1678_v48 = vadd.f32 1.0, %v3476_v17  ;;  %v1669_v53 = vmul.f32 1.442695, %v1639_v43  ;;  %v1640_v7 = vsub.f32 0.0, %v4431_v25  ;;  %v3654_v17 = vld [vmem:[%s4990_s3 + $0x8] sm:$0xff]  }
 0x257   : > { %v3478_v56 = vpop.eup %3477  ;;  %3497 = vrcp.f32 %v1680_v29  ;;  %v1665_v57 = vmul.f32 1.442695, %v1637_v50  ;;  %v1638_v61 = vsub.f32 0.0, %v4435_v46 }
 0x258   : > { %v3480_v19 = vpop.eup %3479  ;;  %3499 = vrcp.f32 %v1678_v48  ;;  %v1671_v35 = vmul.f32 1.442695, %v1640_v7  ;;  %v1707_v11 = vmul.f32 %v3478_v56, %v4362_v13 }
 0x259   : > { %v3482_v16 = vpop.eup %3481  ;;  %3501 = vpow2.f32 %v1669_v53  ;;  %v1667_v1 = vmul.f32 1.442695, %v1638_v61  ;;  %v1705_v20 = vmul.f32 %v3480_v19, %v4366_v47 }
 0x25a   : > { %v3484_v2 = vpop.eup %3483  ;;  %v1708_v3 = vmul.f32 %v3482_v16, %v4371_v59  ;;  %3503 = vpow2.f32 %v1665_v57 }
 0x25b   : > { %v3486_v10 = vpop.eup %3485  ;;  %3505 = vpow2.f32 %v1671_v35  ;;  %v1706_v8 = vmul.f32 %v3484_v2, %v4375_v26  ;;  %v3653_v26 = vld [vmem:[%s4990_s3] sm:$0xff]   ;;  %v3655_v35 = vld [vmem:[%s4990_s3 + $0x10] sm:$0xff]   ;;  %v3656_v2 = vld [vmem:[%s4990_s3 + $0x18] sm:$0xff]  }
 0x25c   : > { %v3488_v32 = vpop.eup %3487  ;;  %v1683_v63 = vadd.f32 1.0, %v3486_v10  ;;  %3507 = vpow2.f32 %v1667_v1  ;;  %v1722_v4 = vpack.c.bf16 %v1708_v3, %v1707_v11 }
 0x25d   : > { %v3490_v28 = vpop.eup %3489  ;;  %v1681_v54 = vadd.f32 1.0, %v3488_v32  ;;  %v1721_v55 = vpack.c.bf16 %v1706_v8, %v1705_v20 }
 0x25e   : > { %v3492_v37 = vpop.eup %3491  ;;  %3509 = vrcp.f32 %v1683_v63  ;;  %v1684_v60 = vadd.f32 1.0, %v3490_v28 }
 0x25f   : > { %v3494_v13 = vpop.eup %3493  ;;  %3511 = vrcp.f32 %v1681_v54  ;;  %v1682_v59 = vadd.f32 1.0, %v3492_v37  ;;  %3164 = vmatprep.mubr.bf16.mxu0 %v1721_v55 }
 0x260   : > { %v3496_v33 = vpop.eup %3495  ;;  %3513 = vrcp.f32 %v1684_v60  ;;  %3165 = vmatmul.mubr.bf16.vlgmr.msra.gmra.mrb[0].mxu0 %v1722_v4  ;;  %v1711_v23 = vmul.f32 %v3494_v13, %v4382_v22  ;;  %v3657_v4 = vld [vmem:[%s4990_s3 + $0x20] sm:$0xff]  }
 0x261   : > { %v3498_v47 = vpop.eup %3497  ;;  %3515 = vrcp.f32 %v1682_v59  ;;  %3181 = vmatpush3.bf16.msra.mxu0 %v3653_v26  ;;  %v1709_v50 = vmul.f32 %v3496_v33, %v4386_v15  ;;  %v3659_v33 = vld [vmem:[%s4990_s3 + $0x30] sm:$0xff]  }
 0x262   : > { %v3500_v9 = vpop.eup %3499  ;;  %v1712_v43 = vmul.f32 %v3498_v47, %v4391_v58  ;;  %3182 = vmatprep.subr.bf16.mxu0 %v3654_v17 }
 0x263   : > { %v3502_v29 = vpop.eup %3501  ;;  %v1710_v48 = vmul.f32 %v3500_v9, %v4395_v0 }
 0x264   : > { %v3504_v53 = vpop.eup %3503  ;;  %v1687_v7 = vadd.f32 1.0, %v3502_v29  ;;  %v1724_v56 = vpack.c.bf16 %v1712_v43, %v1711_v23  ;;  %v4495_v43 = vld [vmem:[%s4993_s6] ss:$0 sm:$0xff] }
 0x265   : > { %v3506_v57 = vpop.eup %3505  ;;  %v1685_v61 = vadd.f32 1.0, %v3504_v53  ;;  %v1723_v19 = vpack.c.bf16 %v1710_v48, %v1709_v50  ;;  %3183 = vmatpush3.bf16.msra.mxu0 %v3654_v17 }
 0x266   : > { %v3508_v22 = vpop.eup %3507  ;;  %3517 = vrcp.f32 %v1687_v7  ;;  %v1688_v58 = vadd.f32 1.0, %v3506_v57  ;;  %3184 = vmatprep.subr.bf16.mxu0 %v3655_v35 }
 0x267   : > { %3519 = vrcp.f32 %v1685_v61  ;;  %v1686_v16 = vadd.f32 1.0, %v3508_v22  ;;  %3168 = vmatprep.mubr.bf16.mxu0 %v1723_v19 }
 0x268   : > { %v3510_v15 = vpop.eup %3509  ;;  %3521 = vrcp.f32 %v1688_v58  ;;  %3169 = vmatmul.mubr.bf16.gmra.mrb[4].mxu0 %v1724_v56 }
 0x269   : > { %v3512_v0 = vpop.eup %3511  ;;  %3523 = vrcp.f32 %v1686_v16  ;;  %3185 = vmatpush3.bf16.msra.mxu0 %v3655_v35  ;;  %v1715_v3 = vmul.f32 %v3510_v15, %v4402_v30 }
 0x26a   : > { %v3514_v1 = vpop.eup %3513  ;;  %3186 = vmatprep.subr.bf16.mxu0 %v3656_v2  ;;  %v1713_v20 = vmul.f32 %v3512_v0, %v4406_v38 }
 0x26b   : > { %v3516_v11 = vpop.eup %3515  ;;  %v1716_v10 = vmul.f32 %v3514_v1, %v4411_v14 }
 0x26c   : > { %v1714_v8 = vmul.f32 %v3516_v11, %v4415_v40  ;;  %v3658_v40 = vld [vmem:[%s4990_s3 + $0x28] sm:$0xff]  }
 0x26d   : > { %v1726_v32 = vpack.c.bf16 %v1716_v10, %v1715_v3  ;;  %3187 = vmatpush3.bf16.msra.mxu0 %v3656_v2 }
 0x26e   : > { %v1725_v63 = vpack.c.bf16 %v1714_v8, %v1713_v20  ;;  %3188 = vmatprep.subr.bf16.mxu0 %v3657_v4 }
 0x270   : > { %v3518_v28 = vpop.eup %3517  ;;  %3172 = vmatprep.mubr.bf16.mxu0 %v1725_v63 }
 0x271   : > { %v3520_v54 = vpop.eup %3519  ;;  %3173 = vmatmul.mubr.bf16.gmra.mrb[8].mxu0 %v1726_v32  ;;  %v1719_v14 = vmul.f32 %v3518_v28, %v4422_v52  ;;  %v3660_v52 = vld [vmem:[%s4990_s3 + $0x38] sm:$0xff]  }
 0x272   : > { %v3522_v55 = vpop.eup %3521  ;;  %3189 = vmatpush3.bf16.msra.mxu0 %v3657_v4  ;;  %v1717_v37 = vmul.f32 %v3520_v54, %v4426_v12  ;;  %v4482_v12 = vld [vmem:[%s4989_s2] sm:$0xff]  }
 0x273   : > { %v3524_v30 = vpop.eup %3523  ;;  %v1720_v38 = vmul.f32 %v3522_v55, %v4431_v25  ;;  %3190 = vmatprep.subr.bf16.mxu0 %v3658_v40 }
 0x274   : > { %v1718_v60 = vmul.f32 %v3524_v30, %v4435_v46  ;;  %v4488_v46 = vld [vmem:[%s4992_s5] ss:$0 sm:$0xff] }
 0x275   : > { %v1728_v13 = vpack.c.bf16 %v1720_v38, %v1719_v14 }
 0x276   : > { %v1727_v59 = vpack.c.bf16 %v1718_v60, %v1717_v37  ;;  %3191 = vmatpush3.bf16.msra.mxu0 %v3658_v40 }
 0x277   : > { %3192 = vmatprep.subr.bf16.mxu0 %v3659_v33 }
 0x278   : > { %3176 = vmatprep.mubr.bf16.mxu0 %v1727_v59 }
 0x279   : > { %3177 = vmatmul.mubr.bf16.gmra.mrb[12].mxu0 %v1728_v13 }
 0x27a   : > { %3193 = vmatpush3.bf16.msra.mxu0 %v3659_v33 }
 0x27b   : > { %3194 = vmatprep.subr.bf16.mxu0 %v3660_v52 }
 0x27e   : > { %3195 = vmatpush3.bf16.msra.mxu0 %v3660_v52 }
 0x27f   : > { %3212 = vmatprep.subr.bf16.mxu0 %v4482_v12 }
 0x333   : > { %v3166_v25 = vpop.f32.mrb[0].mxu0 }
 0x334   : > { %v1828_v47 = vmul.f32 %v4488_v46, %v3166_v25  ;;  %v1763_v26 = vpop.f32.mrb[1].mxu0 }
 0x335   : > { %v1826_v9 = vmul.f32 %v4488_v46, %v1763_v26  ;;  %v3167_v23 = vpop.f32.mrb[2].mxu0 }
 0x336   : > { %v4498_v17 = vadd.f32 %v4495_v43, %v1828_v47  ;;  %v1829_v29 = vmul.f32 %v4488_v46, %v3167_v23  ;;  %v1766_v50 = vpop.f32.mrb[3].mxu0 }
 0x337   : > { %v4502_v48 = vadd.f32 %v4495_v43, %v1826_v9  ;;  %v1827_v53 = vmul.f32 %v4488_v46, %v1766_v50 }
 0x338   : > { %v1860_v7 = vsub.f32 0.0, %v4498_v17  ;;  %v4507_v56 = vadd.f32 %v4495_v43, %v1829_v29 }
 0x339   : > { %v1858_v57 = vsub.f32 0.0, %v4502_v48  ;;  %v4511_v61 = vadd.f32 %v4495_v43, %v1827_v53 }
 0x33a   : > { %v1878_v19 = vmul.f32 1.442695, %v1860_v7  ;;  %v1861_v22 = vsub.f32 0.0, %v4507_v56 }
 0x33b   : > { %v1874_v58 = vmul.f32 1.442695, %v1858_v57  ;;  %v1859_v35 = vsub.f32 0.0, %v4511_v61  ;;  %v3170_v16 = vpop.f32.mrb[4].mxu0 }
 0x33c   : > { %3525 = vpow2.f32 %v1878_v19  ;;  %v1880_v15 = vmul.f32 1.442695, %v1861_v22  ;;  %v1832_v0 = vmul.f32 %v4488_v46, %v3170_v16  ;;  %v1779_v1 = vpop.f32.mrb[5].mxu0 }
 0x33d   : > { %3527 = vpow2.f32 %v1874_v58  ;;  %v1876_v2 = vmul.f32 1.442695, %v1859_v35  ;;  %v1830_v11 = vmul.f32 %v4488_v46, %v1779_v1  ;;  %v3171_v3 = vpop.f32.mrb[6].mxu0 }
 0x33e   : > { %3529 = vpow2.f32 %v1880_v15  ;;  %v4518_v10 = vadd.f32 %v4495_v43, %v1832_v0  ;;  %v1833_v20 = vmul.f32 %v4488_v46, %v3171_v3  ;;  %v1782_v8 = vpop.f32.mrb[7].mxu0 }
 0x33f   : > { %3531 = vpow2.f32 %v1876_v2  ;;  %v4522_v32 = vadd.f32 %v4495_v43, %v1830_v11  ;;  %v1831_v63 = vmul.f32 %v4488_v46, %v1782_v8 }
 0x340   : > { %v1864_v4 = vsub.f32 0.0, %v4518_v10  ;;  %v4527_v28 = vadd.f32 %v4495_v43, %v1833_v20 }
 0x341   : > { %v1862_v54 = vsub.f32 0.0, %v4522_v32  ;;  %v4531_v55 = vadd.f32 %v4495_v43, %v1831_v63 }
 0x342   : > { %v1886_v30 = vmul.f32 1.442695, %v1864_v4  ;;  %v1865_v14 = vsub.f32 0.0, %v4527_v28 }
 0x343   : > { %v1882_v38 = vmul.f32 1.442695, %v1862_v54  ;;  %v1863_v40 = vsub.f32 0.0, %v4531_v55 }
 0x344   : > { %3533 = vpow2.f32 %v1886_v30  ;;  %v1888_v37 = vmul.f32 1.442695, %v1865_v14  ;;  %v3174_v60 = vpop.f32.mrb[8].mxu0 }
 0x345   : > { %3535 = vpow2.f32 %v1882_v38  ;;  %v1884_v13 = vmul.f32 1.442695, %v1863_v40  ;;  %v1836_v59 = vmul.f32 %v4488_v46, %v3174_v60  ;;  %v1795_v33 = vpop.f32.mrb[9].mxu0 }
 0x346   : > { %v3526_v52 = vpop.eup %3525  ;;  %3537 = vpow2.f32 %v1888_v37  ;;  %v1834_v25 = vmul.f32 %v4488_v46, %v1795_v33  ;;  %v3175_v47 = vpop.f32.mrb[10].mxu0 }
 0x347   : > { %v3528_v26 = vpop.eup %3527  ;;  %v1908_v9 = vadd.f32 1.0, %v3526_v52  ;;  %3539 = vpow2.f32 %v1884_v13  ;;  %v4538_v23 = vadd.f32 %v4495_v43, %v1836_v59  ;;  %v1837_v29 = vmul.f32 %v4488_v46, %v3175_v47  ;;  %v1798_v50 = vpop.f32.mrb[11].mxu0 }
 0x348   : > { %v3530_v53 = vpop.eup %3529  ;;  %v1906_v7 = vadd.f32 1.0, %v3528_v26  ;;  %v4542_v57 = vadd.f32 %v4495_v43, %v1834_v25  ;;  %v1835_v19 = vmul.f32 %v4488_v46, %v1798_v50 }
 0x349   : > { %v3532_v22 = vpop.eup %3531  ;;  %3541 = vrcp.f32 %v1908_v9  ;;  %v1909_v58 = vadd.f32 1.0, %v3530_v53  ;;  %v1868_v35 = vsub.f32 0.0, %v4538_v23  ;;  %v4547_v16 = vadd.f32 %v4495_v43, %v1837_v29 }
 0x34a   : > { %3543 = vrcp.f32 %v1906_v7  ;;  %v1907_v15 = vadd.f32 1.0, %v3532_v22  ;;  %v1866_v0 = vsub.f32 0.0, %v4542_v57  ;;  %v4551_v1 = vadd.f32 %v4495_v43, %v1835_v19 }
 0x34b   : > { %3545 = vrcp.f32 %v1909_v58  ;;  %v1894_v2 = vmul.f32 1.442695, %v1868_v35  ;;  %v1869_v11 = vsub.f32 0.0, %v4547_v16 }
 0x34c   : > { %3547 = vrcp.f32 %v1907_v15  ;;  %v1890_v3 = vmul.f32 1.442695, %v1866_v0  ;;  %v1867_v20 = vsub.f32 0.0, %v4551_v1  ;;  %v3178_v8 = vpop.f32.mrb[12].mxu0 }
 0x34d   : > { %3549 = vpow2.f32 %v1894_v2  ;;  %v1896_v63 = vmul.f32 1.442695, %v1869_v11  ;;  %v1840_v4 = vmul.f32 %v4488_v46, %v3178_v8  ;;  %v1811_v54 = vpop.f32.mrb[13].mxu0 }
 0x34e   : > { %v3534_v30 = vpop.eup %3533  ;;  %3551 = vpow2.f32 %v1890_v3  ;;  %v1892_v14 = vmul.f32 1.442695, %v1867_v20  ;;  %v1838_v38 = vmul.f32 %v4488_v46, %v1811_v54  ;;  %v3179_v40 = vpop.f32.mrb[14].mxu0 }
 0x34f   : > { %v3536_v37 = vpop.eup %3535  ;;  %v1912_v60 = vadd.f32 1.0, %v3534_v30  ;;  %3553 = vpow2.f32 %v1896_v63  ;;  %v4558_v13 = vadd.f32 %v4495_v43, %v1840_v4  ;;  %v1841_v59 = vmul.f32 %v4488_v46, %v3179_v40  ;;  %v1814_v33 = vpop.f32.mrb[15].mxu0 }
 0x350   : > { %v3538_v52 = vpop.eup %3537  ;;  %v1910_v25 = vadd.f32 1.0, %v3536_v37  ;;  %3555 = vpow2.f32 %v1892_v14  ;;  %v4562_v47 = vadd.f32 %v4495_v43, %v1838_v38  ;;  %v1839_v26 = vmul.f32 %v4488_v46, %v1814_v33 }
 0x351   : > { %v3540_v9 = vpop.eup %3539  ;;  %3557 = vrcp.f32 %v1912_v60  ;;  %v1913_v29 = vadd.f32 1.0, %v3538_v52  ;;  %v1872_v50 = vsub.f32 0.0, %v4558_v13  ;;  %v4567_v53 = vadd.f32 %v4495_v43, %v1841_v59 }
 0x352   : > { %3559 = vrcp.f32 %v1910_v25  ;;  %v1911_v7 = vadd.f32 1.0, %v3540_v9  ;;  %v1870_v19 = vsub.f32 0.0, %v4562_v47  ;;  %v4571_v22 = vadd.f32 %v4495_v43, %v1839_v26 }
 0x353   : > { %v3542_v58 = vpop.eup %3541  ;;  %3561 = vrcp.f32 %v1913_v29  ;;  %v1902_v35 = vmul.f32 1.442695, %v1872_v50  ;;  %v1873_v46 = vsub.f32 0.0, %v4567_v53 }
 0x354   : > { %v3544_v15 = vpop.eup %3543  ;;  %v1940_v0 = vmul.f32 %v3542_v58, %v4498_v17  ;;  %3563 = vrcp.f32 %v1911_v7  ;;  %v1898_v2 = vmul.f32 1.442695, %v1870_v19  ;;  %v1871_v8 = vsub.f32 0.0, %v4571_v22 }
 0x355   : > { %v3546_v11 = vpop.eup %3545  ;;  %v4576_v3 = vmul.f32 %v3544_v15, %v4502_v48  ;;  %3565 = vpow2.f32 %v1902_v35  ;;  %v1904_v20 = vmul.f32 1.442695, %v1873_v46 }
 0x356   : > { %v3548_v43 = vpop.eup %3547  ;;  %v1956_v63 = vrot.slane %v1940_v0, 7  ;;  %v2004_v4 = vrot.slane %v1940_v0, 1  ;;  %v4580_v54 = vmul.f32 %v3546_v11, %v4507_v56  ;;  %3567 = vpow2.f32 %v1898_v2 }
 0x357   : > { %v3550_v30 = vpop.eup %3549  ;;  %v1954_v17 = vrot.slane %v4576_v3, 7  ;;  %v2002_v14 = vrot.slane %v4576_v3, 1  ;;  %v1939_v38 = vmul.f32 %v3548_v43, %v4511_v61  ;;  %3569 = vpow2.f32 %v1904_v20 }
 0x358   : > { %v3552_v48 = vpop.eup %3551  ;;  %v1957_v40 = vrot.slane %v4580_v54, 7  ;;  %v2005_v37 = vrot.slane %v4580_v54, 1  ;;  %v2059_v60 = vpack.c.bf16 %v4580_v54, %v1940_v0  ;;  %v1916_v59 = vadd.f32 1.0, %v3550_v30 }
 0x359   : > { %v3554_v33 = vpop.eup %3553  ;;  %v1955_v56 = vrot.slane %v1939_v38, 7  ;;  %v2003_v52 = vrot.slane %v1939_v38, 1  ;;  %v1914_v25 = vadd.f32 1.0, %v3552_v48  ;;  %v1900_v26 = vmul.f32 1.442695, %v1871_v8 }
 0x35a   : > { %v3556_v9 = vpop.eup %3555  ;;  %v4590_v29 = vsel %vm5038_vm3, %v1956_v63, %v1957_v40  ;;  %v4594_v61 = vsel %vm5039_vm14, %v2004_v4, %v2005_v37  ;;  %3571 = vrcp.f32 %v1916_v59  ;;  %v1917_v50 = vadd.f32 1.0, %v3554_v33 }
 0x35b   : > { %v3558_v7 = vpop.eup %3557  ;;  %v4598_v19 = vsel %vm5040_vm13, %v1955_v56, %v1956_v63  ;;  %3573 = vrcp.f32 %v1914_v25  ;;  %v1915_v58 = vadd.f32 1.0, %v3556_v9  ;;  %v2058_v35 = vpack.c.bf16 %v1939_v38, %v4576_v3  ;;  %vm5041_vm13 = vmmov %vm5039_vm14 }
 0x35c   : > { %v3560_v46 = vpop.eup %3559  ;;  %v2765_v15 = vpack.c.bf16 %v4590_v29, %v4598_v19  ;;  %v1944_v0 = vmul.f32 %v3558_v7, %v4518_v10  ;;  %3575 = vrcp.f32 %v1917_v50  ;;  %v4608_v2 = vsel %vm5038_vm3, %v1954_v17, %v1955_v56  ;;  %vm5042_vm3 = vmmov %vm5041_vm13  ;;  %v3675_v29 = vld [vmem:[%s4991_s4 + $0x20] sm:$0xff]  }
 0x35d   : > { %v3562_v11 = vpop.eup %3561  ;;  %v1942_v20 = vmul.f32 %v3560_v46, %v4522_v32  ;;  %3577 = vrcp.f32 %v1915_v58  ;;  %3196 = vmatprep.mubr.bf16.mxu0 %v2058_v35  ;;  %v4613_v8 = vsel %vm5039_vm14, %v2003_v52, %v2004_v4  ;;  %v4619_v10 = vsel %vm5041_vm13, %v2002_v14, %v2003_v52 }
 0x35e   : > { %v3564_v43 = vpop.eup %3563  ;;  %v1960_v63 = vrot.slane %v1944_v0, 7  ;;  %v2008_v54 = vrot.slane %v1944_v0, 1  ;;  %v4622_v30 = vmul.f32 %v3562_v11, %v4527_v28  ;;  %3579 = vpow2.f32 %v1900_v26  ;;  %3197 = vmatmul.mubr.bf16.vlgmr.msra.gmra.mrb[16].mxu0 %v2059_v60  ;;  %v3664_v28 = vld [vmem:[%s4989_s2 + $0x8] sm:$0xff]  }
 0x35f   : > { %v3566_v32 = vpop.eup %3565  ;;  %v1958_v38 = vrot.slane %v1942_v20, 7  ;;  %v2006_v48 = vrot.slane %v1942_v20, 1  ;;  %v1943_v4 = vmul.f32 %v3564_v43, %v4531_v55  ;;  %3213 = vmatpush3.bf16.msra.mxu0 %v4482_v12  ;;  %vm5043_vm14 = vcmp.lt.s32.totalorder %v3900_v45, 1 }
 0x360   : > { %v3568_v33 = vpop.eup %3567  ;;  %v1961_v56 = vrot.slane %v4622_v30, 7  ;;  %v2009_v52 = vrot.slane %v4622_v30, 1  ;;  %v1920_v25 = vadd.f32 1.0, %v3566_v32  ;;  %3214 = vmatprep.subr.bf16.mxu0 %v3664_v28  ;;  %v2061_v60 = vpack.c.bf16 %v4622_v30, %v1944_v0  ;;  %vm5044_vm13 = vmmov %vm5043_vm14 }
 0x361   : > { %v3570_v26 = vpop.eup %3569  ;;  %v4636_v12 = vsel %vm5042_vm3, %v2005_v37, %v2006_v48  ;;  %v1959_v55 = vrot.slane %v1943_v4, 7  ;;  %v2007_v9 = vrot.slane %v1943_v4, 1  ;;  %v1918_v50 = vadd.f32 1.0, %v3568_v33  ;;  %vm5045_vm3 = vmmov %vm5044_vm13 }
 0x362   : > { %3581 = vrcp.f32 %v1920_v25  ;;  %v1921_v58 = vadd.f32 1.0, %v3570_v26  ;;  %v2060_v35 = vpack.c.bf16 %v1943_v4, %v1942_v20  ;;  %v4646_v0 = vsel %vm5044_vm13, %v1957_v40, %v1958_v38  ;;  %v3665_v20 = vld [vmem:[%s4989_s2 + $0x10] sm:$0xff]  }
 0x363   : > { %3583 = vrcp.f32 %v1918_v50  ;;  %3215 = vmatpush3.bf16.msra.mxu0 %v3664_v28  ;;  %v4642_v46 = vsel %vm5043_vm14, %v1958_v38, %v1959_v55  ;;  %v4650_v37 = vsel %vm5045_vm3, %v1960_v63, %v1961_v56  ;;  %vm5046_vm14 = vmmov %vm5045_vm3  ;;  %vm5047_vm13 = vcmp.lt.s32.totalorder %v3900_v45, 7  ;;  %v3672_v45 = vld [vmem:[%s4991_s4 + $0x8] sm:$0xff]  }
 0x364   : > { %v3572_v11 = vpop.eup %3571  ;;  %3585 = vrcp.f32 %v1921_v58  ;;  %3200 = vmatprep.mubr.bf16.mxu0 %v2060_v35  ;;  %3216 = vmatprep.subr.bf16.mxu0 %v3665_v20  ;;  %v2768_v43 = vpack.c.bf16 %v4642_v46, %v4646_v0  ;;  %v4659_v30 = vsel %vm5046_vm14, %v1959_v55, %v1960_v63  ;;  %v4663_v40 = vsel %vm5047_vm13, %v2007_v9, %v2008_v54  ;;  %vm5048_vm3 = vmmov %vm5047_vm13 }
 0x365   : > { %v3574_v32 = vpop.eup %3573  ;;  %v1948_v38 = vmul.f32 %v3572_v11, %v4538_v23  ;;  %v4670_v33 = vsel %vm5048_vm3, %v2006_v48, %v2007_v9  ;;  %vm5049_vm0 = vmmov %vm5048_vm3  ;;  %v5064_v18 = vpack.c.bf16 %v4650_v37, %v4659_v30  ;;  %v5066_v21 = vpack.c.bf16 %v4613_v8, %v4619_v10 }
 0x366   : > { %v4674_v25 = vsel %vm5049_vm0, %v2008_v54, %v2009_v52  ;;  %v3576_v63 = vpop.eup %3575  ;;  %v1946_v28 = vmul.f32 %v3574_v32, %v4542_v57  ;;  %3201 = vmatmul.mubr.bf16.gmra.mrb[20].mxu0 %v2061_v60  ;;  %v3666_v54 = vld [vmem:[%s4989_s2 + $0x18] sm:$0xff]   ;;  %vm5050_vm0 = vmmov %vm5046_vm14  ;;  %v5069_v27 = vpack.c.bf16 %v4663_v40, %v4670_v33 }
 0x367   : > { %v3578_v55 = vpop.eup %3577  ;;  %v1964_v23 = vrot.slane %v1948_v38, 7  ;;  %v1949_v50 = vmul.f32 %v3576_v63, %v4547_v16  ;;  %3217 = vmatpush3.bf16.msra.mxu0 %v3665_v20  ;;  %v2012_v35 = vrot.slane %v1948_v38, 1  ;;  %vm5051_vm14 = vmmov %vm5050_vm0 }
 0x368   : > { %v3580_v58 = vpop.eup %3579  ;;  %v1962_v48 = vrot.slane %v1946_v28, 7  ;;  %v2010_v9 = vrot.slane %v1946_v28, 1  ;;  %v1947_v11 = vmul.f32 %v3578_v55, %v4551_v1  ;;  %3218 = vmatprep.subr.bf16.mxu0 %v3666_v54  ;;  %vm5052_vm13 = vmmov %vm5048_vm3 }
 0x369   : > { %v1965_v57 = vrot.slane %v1949_v50, 7  ;;  %v2013_v60 = vrot.slane %v1949_v50, 1  ;;  %v1919_v32 = vadd.f32 1.0, %v3580_v58  ;;  %v2063_v26 = vpack.c.bf16 %v1949_v50, %v1948_v38 }
 0x36a   : > { %v1963_v7 = vrot.slane %v1947_v11, 7  ;;  %v2011_v59 = vrot.slane %v1947_v11, 1  ;;  %v2062_v4 = vpack.c.bf16 %v1947_v11, %v1946_v28  ;;  %v4686_v16 = vsel %vm5050_vm0, %v1961_v56, %v1962_v48  ;;  %v3667_v56 = vld [vmem:[%s4989_s2 + $0x20] sm:$0xff]   ;;  %v3670_v11 = vld [vmem:[%s4989_s2 + $0x38] sm:$0xff]  }
 0x36b   : > { %3587 = vrcp.f32 %v1919_v32  ;;  %3219 = vmatpush3.bf16.msra.mxu0 %v3666_v54  ;;  %v4690_v1 = vsel %vm5051_vm14, %v1964_v23, %v1965_v57  ;;  %v4694_v20 = vsel %vm5052_vm13, %v2009_v52, %v2010_v9  ;;  %v4698_v38 = vsel %vm5048_vm3, %v2012_v35, %v2013_v60  ;;  %vm5053_vm14 = vmmov %vm5050_vm0 }
 0x36c   : > { %v3582_v63 = vpop.eup %3581  ;;  %3204 = vmatprep.mubr.bf16.mxu0 %v2062_v4  ;;  %3220 = vmatprep.subr.bf16.mxu0 %v3667_v56  ;;  %v4705_v28 = vsel %vm5050_vm0, %v1962_v48, %v1963_v7  ;;  %v4709_v55 = vsel %vm5053_vm14, %v1963_v7, %v1964_v23  ;;  %vm5054_vm13 = vmmov %vm5048_vm3  ;;  %v4725_v23 = vsel %vm5048_vm3, %v2010_v9, %v2011_v59 }
 0x36d   : > { %v3584_v50 = vpop.eup %3583  ;;  %v1952_v58 = vmul.f32 %v3582_v63, %v4558_v13  ;;  %v2774_v4 = vpack.c.bf16 %v4705_v28, %v4686_v16  ;;  %v4720_v48 = vsel %vm5054_vm13, %v2011_v59, %v2012_v35  ;;  %v3668_v35 = vld [vmem:[%s4989_s2 + $0x28] sm:$0xff]   ;;  %vm5055_vm14 = vmmov %vm5048_vm3  ;;  %v5065_v19 = vpack.c.bf16 %v4690_v1, %v4709_v55 }
 0x36e   : > { %v3586_v54 = vpop.eup %3585  ;;  %v1950_v7 = vmul.f32 %v3584_v50, %v4562_v47  ;;  %3205 = vmatmul.mubr.bf16.gmra.mrb[24].mxu0 %v2063_v26  ;;  %vm5056_vm13 = vmmov %vm5050_vm0  ;;  %v5071_v5 = vpack.c.bf16 %v4694_v20, %v4674_v25  ;;  %v5072_v8 = vpack.c.bf16 %v4720_v48, %v4725_v23 }
 0x36f   : > { %v1953_v13 = vmul.f32 %v3586_v54, %v4567_v53  ;;  %3221 = vmatpush3.bf16.msra.mxu0 %v3667_v56  ;;  %v1968_v16 = vrot.slane %v1952_v58, 7  ;;  %v2016_v47 = vrot.slane %v1952_v58, 1  ;;  %vm5057_vm3 = vmmov %vm5050_vm0 }
 0x370   : > { %v1966_v63 = vrot.slane %v1950_v7, 7  ;;  %v2014_v28 = vrot.slane %v1950_v7, 1  ;;  %3222 = vmatprep.subr.bf16.mxu0 %v3668_v35  ;;  %vm5058_vm5 = vmmov %vm5055_vm14 }
 0x371   : > { %v1969_v26 = vrot.slane %v1953_v13, 7  ;;  %v2017_v50 = vrot.slane %v1953_v13, 1  ;;  %v2065_v52 = vpack.c.bf16 %v1953_v13, %v1952_v58 }
 0x372   : > { %v1973_v59 = vsel %vm5050_vm0, %v1965_v57, %v1966_v63  ;;  %v4737_v53 = vsel %vm5055_vm14, %v2013_v60, %v2014_v28  ;;  %v3669_v57 = vld [vmem:[%s4989_s2 + $0x30] sm:$0xff]   ;;  %vm5059_vm0 = vmmov %vm5058_vm5 }
 0x373   : > { %3223 = vmatpush3.bf16.msra.mxu0 %v3668_v35  ;;  %v1985_v9 = vsel %vm5056_vm13, %v1969_v26, %v1954_v17  ;;  %v1970_v56 = vsel %vm5057_vm3, %v1968_v16, %v1969_v26  ;;  %v2801_v54 = vpack.c.bf16 %v4737_v53, %v4698_v38  ;;  %v4749_v58 = vsel %vm5058_vm5, %v2016_v47, %v2017_v50  ;;  %vm5060_vm5 = vmmov %vm5057_vm3 }
 0x374   : > { %3224 = vmatprep.subr.bf16.mxu0 %v3669_v57  ;;  %v2762_v60 = vpack.c.bf16 %v4608_v2, %v1985_v9  ;;  %v2033_v17 = vsel %vm5059_vm0, %v2017_v50, %v2002_v14  ;;  %vm5061_vm14 = vmmov %vm5057_vm3 }
 0x375   : > { %v3588_v13 = vpop.eup %3587  ;;  %v2807_v35 = vpack.c.bf16 %v2033_v17, %v4749_v58  ;;  %vm5062_vm13 = vmmov %vm5059_vm0 }
 0x376   : > { %v1951_v38 = vmul.f32 %v3588_v13, %v4571_v22  ;;  %vm5063_vm3 = vmmov %vm5059_vm0 }
 0x377   : > { %3225 = vmatpush3.bf16.msra.mxu0 %v3669_v57 }
 0x378   : > { %v1967_v26 = vrot.slane %v1951_v38, 7  ;;  %v2015_v53 = vrot.slane %v1951_v38, 1  ;;  %v2064_v32 = vpack.c.bf16 %v1951_v38, %v1950_v7  ;;  %3226 = vmatprep.subr.bf16.mxu0 %v3670_v11 }
 0x37a   : > { %3208 = vmatprep.mubr.bf16.mxu0 %v2064_v32  ;;  %v1972_v3 = vsel %vm5060_vm5, %v1966_v63, %v1967_v26  ;;  %v1971_v14 = vsel %vm5061_vm14, %v1967_v26, %v1968_v16  ;;  %v2019_v2 = vsel %vm5062_vm13, %v2015_v53, %v2016_v47  ;;  %v2020_v22 = vsel %vm5063_vm3, %v2014_v28, %v2015_v53  ;;  %v3671_v32 = vld [vmem:[%s4991_s4] sm:$0xff]  }
 0x37b   : > { %3209 = vmatmul.mubr.bf16.gmra.mrb[28].mxu0 %v2065_v52  ;;  %v2780_v7 = vpack.c.bf16 %v1972_v3, %v1973_v59  ;;  %v2783_v50 = vpack.c.bf16 %v1970_v56, %v1971_v14  ;;  %v2804_v9 = vpack.c.bf16 %v2019_v2, %v2020_v22 }
 0x37c   : > { %3228 = vmatprep.mubr.msk.bf16.mxu0 %vm4118_vm4, %v2762_v60  ;;  %3227 = vmatpush3.bf16.msra.mxu0 %v3670_v11  ;;  %vm5068_vm4 = vnez %v5025_v24 }
 0x37d   : > { %3244 = vmatprep.subr.bf16.mxu0 %v3671_v32 }
 0x383   : > { %3229 = vmatmul.mubr.msk.bf16.vlgmr.msra.gmra.mrb[16].mxu0 %vm4171_vm7, %v2765_v15  ;;  %v5067_v15 = vpack.c.bf16 %v4636_v12, %v4594_v61  ;;  %vm5070_vm7 = vnez %v5027_v49  ;;  %v4858_v49 = vld [vmem:[%s4994_s7] ss:$0 sm:$0xff] }
 0x384   : > { %3245 = vmatpush3.bf16.msra.mxu0 %v3671_v32  ;;  %3232 = vmatprep.mubr.msk.bf16.mxu0 %vm4176_vm8, %v2768_v43  ;;  %vm5073_vm8 = vnez %v5031_v34 }
 0x385   : > { %3246 = vmatprep.subr.bf16.mxu0 %v3672_v45 }
 0x388   : > { %3247 = vmatpush3.bf16.msra.mxu0 %v3672_v45 }
 0x389   : > { %3248 = vmatprep.subr.bf16.mxu0 %v3673_v62 }
 0x38b   : > { %3233 = vmatmul.mubr.msk.bf16.gmra.mrb[20].mxu0 %vm4199_vm11, %v5064_v18  ;;  %vm5074_vm11 = vnez %v5035_v42 }
 0x38c   : > { %3249 = vmatpush3.bf16.msra.mxu0 %v3673_v62  ;;  %3236 = vmatprep.mubr.msk.bf16.mxu0 %vm4204_vm12, %v2774_v4  ;;  %vm5075_vm12 = vnez %v5037_v6 }
 0x38d   : > { %3250 = vmatprep.subr.bf16.mxu0 %v3674_v51 }
 0x390   : > { %3251 = vmatpush3.bf16.msra.mxu0 %v3674_v51 }
 0x391   : > { %3252 = vmatprep.subr.bf16.mxu0 %v3675_v29 }
 0x393   : > { %3237 = vmatmul.mubr.msk.bf16.gmra.mrb[24].mxu0 %vm4227_vm15, %v5065_v19 }
 0x394   : > { %3253 = vmatpush3.bf16.msra.mxu0 %v3675_v29  ;;  %3240 = vmatprep.mubr.msk.bf16.mxu0 %vm4232_vm2, %v2780_v7 }
 0x395   : > { %3254 = vmatprep.subr.bf16.mxu0 %v3676_v39 }
 0x398   : > { %3255 = vmatpush3.bf16.msra.mxu0 %v3676_v39 }
 0x399   : > { %3256 = vmatprep.subr.bf16.mxu0 %v3677_v44 }
 0x39b   : > { %3241 = vmatmul.mubr.msk.bf16.gmra.mrb[28].mxu0 %vm4252_vm9, %v2783_v50 }
 0x39c   : > { %3257 = vmatpush3.bf16.msra.mxu0 %v3677_v44  ;;  %3260 = vmatprep.mubr.msk.bf16.mxu0 %vm4257_vm10, %v5066_v21 }
 0x39d   : > { %3258 = vmatprep.subr.bf16.mxu0 %v3678_v31 }
 0x3a0   : > { %3259 = vmatpush3.bf16.msra.mxu0 %v3678_v31 }
 0x3a3   : > { %3261 = vmatmul.mubr.msk.bf16.vlgmr.msra.gmra.mrb[16].mxu0 %vm5068_vm4, %v5067_v15 }
 0x3a4   : > { %3264 = vmatprep.mubr.msk.bf16.mxu0 %vm5070_vm7, %v5069_v27 }
 0x3ab   : > { %3265 = vmatmul.mubr.msk.bf16.gmra.mrb[20].mxu0 %vm4299_vm1, %v5071_v5 }
 0x3ac   : > { %3268 = vmatprep.mubr.msk.bf16.mxu0 %vm5073_vm8, %v5072_v8 }
 0x3b3   : > { %3269 = vmatmul.mubr.msk.bf16.gmra.mrb[24].mxu0 %vm4320_vm6, %v2801_v54 }
 0x3b4   : > { %3272 = vmatprep.mubr.msk.bf16.mxu0 %vm5074_vm11, %v2804_v9 }
 0x3bb   : > { %3273 = vmatmul.mubr.msk.bf16.gmra.mrb[28].mxu0 %vm5075_vm12, %v2807_v35 }
 0x476   : > { %v3262_v24 = vpop.f32.mrb[16].mxu0 }
 0x477   : > { %v2383_v41 = vmul.f32 %v4858_v49, %v3262_v24  ;;  %v2302_v61 = vpop.f32.mrb[17].mxu0 }
 0x478   : > { %v2381_v34 = vmul.f32 %v4858_v49, %v2302_v61  ;;  %v3263_v10 = vpop.f32.mrb[18].mxu0 }
 0x479   : > { %v4868_v42 = vadd.f32 %v4865_v36, %v2383_v41  ;;  %v2384_v6 = vmul.f32 %v4858_v49, %v3263_v10  ;;  %v2305_v12 = vpop.f32.mrb[19].mxu0 }
 0x47a   : > { %v4872_v46 = vadd.f32 %v4865_v36, %v2381_v34  ;;  %v2382_v0 = vmul.f32 %v4858_v49, %v2305_v12 }
 0x47b   : > { %v2415_v37 = vsub.f32 0.0, %v4868_v42  ;;  %v4877_v43 = vadd.f32 %v4865_v36, %v2384_v6 }
 0x47c   : > { %v2413_v30 = vsub.f32 0.0, %v4872_v46  ;;  %v4881_v40 = vadd.f32 %v4865_v36, %v2382_v0 }
 0x47d   : > { %v2433_v33 = vmul.f32 1.442695, %v2415_v37  ;;  %v2416_v25 = vsub.f32 0.0, %v4877_v43 }
 0x47e   : > { %v2429_v1 = vmul.f32 1.442695, %v2413_v30  ;;  %v2414_v20 = vsub.f32 0.0, %v4881_v40  ;;  %v3266_v55 = vpop.f32.mrb[20].mxu0 }
 0x47f   : > { %3589 = vpow2.f32 %v2433_v33  ;;  %v2435_v52 = vmul.f32 1.442695, %v2416_v25  ;;  %v2387_v4 = vmul.f32 %v4858_v49, %v3266_v55  ;;  %v2318_v11 = vpop.f32.mrb[21].mxu0 }
 0x480   : > { %3591 = vpow2.f32 %v2429_v1  ;;  %v2431_v48 = vmul.f32 1.442695, %v2414_v20  ;;  %v2385_v23 = vmul.f32 %v4858_v49, %v2318_v11  ;;  %v3267_v16 = vpop.f32.mrb[22].mxu0  ;;  %v3681_v1 = vld [vmem:[%s3773_s20 + $0x8] sm:$0xff]  }
 0x481   : > { %3593 = vpow2.f32 %v2435_v52  ;;  %v4888_v63 = vadd.f32 %v4865_v36, %v2387_v4  ;;  %v2388_v28 = vmul.f32 %v4858_v49, %v3267_v16  ;;  %v2321_v47 = vpop.f32.mrb[23].mxu0  ;;  %v352_v20 = vunpack.c.l.bf16 %v3681_v1 }
 0x482   : > { %3595 = vpow2.f32 %v2431_v48  ;;  %v4892_v59 = vadd.f32 %v4865_v36, %v2385_v23  ;;  %v2386_v56 = vmul.f32 %v4858_v49, %v2321_v47 }
 0x483   : > { %v2419_v54 = vsub.f32 0.0, %v4888_v63  ;;  %v4897_v58 = vadd.f32 %v4865_v36, %v2388_v28 }
 0x484   : > { %v2417_v57 = vsub.f32 0.0, %v4892_v59  ;;  %v4901_v60 = vadd.f32 %v4865_v36, %v2386_v56 }
 0x485   : > { %v2441_v17 = vmul.f32 1.442695, %v2419_v54  ;;  %v2420_v13 = vsub.f32 0.0, %v4897_v58 }
 0x486   : > { %v2437_v35 = vmul.f32 1.442695, %v2417_v57  ;;  %v2418_v38 = vsub.f32 0.0, %v4901_v60  ;;  %v3270_v26 = vpop.f32.mrb[24].mxu0 }
 0x487   : > { %3597 = vpow2.f32 %v2441_v17  ;;  %v2443_v53 = vmul.f32 1.442695, %v2420_v13  ;;  %v2391_v3 = vmul.f32 %v4858_v49, %v3270_v26  ;;  %v2334_v14 = vpop.f32.mrb[25].mxu0 }
 0x488   : > { %3599 = vpow2.f32 %v2437_v35  ;;  %v2439_v2 = vmul.f32 1.442695, %v2418_v38  ;;  %v2389_v22 = vmul.f32 %v4858_v49, %v2334_v14  ;;  %v3271_v7 = vpop.f32.mrb[26].mxu0 }
 0x489   : > { %v3590_v50 = vpop.eup %3589  ;;  %3601 = vpow2.f32 %v2443_v53  ;;  %v4908_v9 = vadd.f32 %v4865_v36, %v2391_v3  ;;  %v2392_v32 = vmul.f32 %v4858_v49, %v3271_v7  ;;  %v2337_v45 = vpop.f32.mrb[27].mxu0  ;;  %v3682_v3 = vld [vmem:[%s3773_s20] sm:$0xff]  }
 0x48a   : > { %v3592_v62 = vpop.eup %3591  ;;  %v2463_v18 = vadd.f32 1.0, %v3590_v50  ;;  %3603 = vpow2.f32 %v2439_v2  ;;  %v4912_v51 = vadd.f32 %v4865_v36, %v2389_v22  ;;  %v2390_v29 = vmul.f32 %v4858_v49, %v2337_v45 }
 0x48b   : > { %v3594_v19 = vpop.eup %3593  ;;  %v2461_v39 = vadd.f32 1.0, %v3592_v62  ;;  %v2423_v44 = vsub.f32 0.0, %v4908_v9  ;;  %v4917_v21 = vadd.f32 %v4865_v36, %v2392_v32  ;;  %v350_v14 = vunpack.c.l.bf16 %v3682_v3 }
 0x48c   : > { %v3596_v31 = vpop.eup %3595  ;;  %3605 = vrcp.f32 %v2463_v18  ;;  %v2464_v15 = vadd.f32 1.0, %v3594_v19  ;;  %v2421_v27 = vsub.f32 0.0, %v4912_v51  ;;  %v4921_v5 = vadd.f32 %v4865_v36, %v2390_v29 }
 0x48d   : > { %3607 = vrcp.f32 %v2461_v39  ;;  %v2462_v8 = vadd.f32 1.0, %v3596_v31  ;;  %v2449_v24 = vmul.f32 1.442695, %v2423_v44  ;;  %v2424_v41 = vsub.f32 0.0, %v4917_v21 }
 0x48e   : > { %3609 = vrcp.f32 %v2464_v15  ;;  %v2445_v61 = vmul.f32 1.442695, %v2421_v27  ;;  %v2422_v34 = vsub.f32 0.0, %v4921_v5  ;;  %v3274_v10 = vpop.f32.mrb[28].mxu0  ;;  %v353_v50 = vunpack.c.h.bf16 %v3681_v1 }
 0x48f   : > { %3611 = vrcp.f32 %v2462_v8  ;;  %v2451_v6 = vmul.f32 1.442695, %v2424_v41  ;;  %v2395_v12 = vmul.f32 %v4858_v49, %v3274_v10  ;;  %v2350_v0 = vpop.f32.mrb[29].mxu0  ;;  %v351_v62 = vunpack.c.h.bf16 %v3682_v3 }
 0x490   : > { %3613 = vpow2.f32 %v2449_v24  ;;  %v2447_v37 = vmul.f32 1.442695, %v2422_v34  ;;  %v2393_v30 = vmul.f32 %v4858_v49, %v2350_v0  ;;  %v3275_v33 = vpop.f32.mrb[30].mxu0  ;;  %v3683_v34 = vld [vmem:[%s3773_s20 + $0x18] sm:$0xff]   ;;  %v3684_v0 = vld [vmem:[%s3773_s20 + $0x10] sm:$0xff]  }
 0x491   : > { %v3598_v25 = vpop.eup %3597  ;;  %3615 = vpow2.f32 %v2445_v61  ;;  %v4929_v55 = vadd.f32 %v4865_v36, %v2395_v12  ;;  %v2396_v52 = vmul.f32 %v4858_v49, %v3275_v33  ;;  %v2353_v4 = vpop.f32.mrb[31].mxu0  ;;  %v356_v10 = vunpack.c.l.bf16 %v3683_v34 }
 0x492   : > { %v3600_v11 = vpop.eup %3599  ;;  %v2467_v48 = vadd.f32 1.0, %v3598_v25  ;;  %3617 = vpow2.f32 %v2451_v6  ;;  %v4933_v23 = vadd.f32 %v4865_v36, %v2393_v30  ;;  %v2394_v16 = vmul.f32 %v4858_v49, %v2353_v4 }
 0x493   : > { %v3602_v28 = vpop.eup %3601  ;;  %v2465_v47 = vadd.f32 1.0, %v3600_v11  ;;  %3619 = vpow2.f32 %v2447_v37  ;;  %v2427_v56 = vsub.f32 0.0, %v4929_v55  ;;  %v4938_v54 = vadd.f32 %v4865_v36, %v2396_v52 }
 0x494   : > { %v3604_v57 = vpop.eup %3603  ;;  %3621 = vrcp.f32 %v2467_v48  ;;  %v2468_v17 = vadd.f32 1.0, %v3602_v28  ;;  %v2425_v13 = vsub.f32 0.0, %v4933_v23  ;;  %v4942_v35 = vadd.f32 %v4865_v36, %v2394_v16 }
 0x495   : > { %3623 = vrcp.f32 %v2465_v47  ;;  %v2466_v38 = vadd.f32 1.0, %v3604_v57  ;;  %v2457_v49 = vmul.f32 1.442695, %v2427_v56  ;;  %v2428_v26 = vsub.f32 0.0, %v4938_v54 }
 0x496   : > { %v3606_v53 = vpop.eup %3605  ;;  %3625 = vrcp.f32 %v2468_v17  ;;  %v2453_v2 = vmul.f32 1.442695, %v2425_v13  ;;  %v2426_v22 = vsub.f32 0.0, %v4942_v35  ;;  %v354_v37 = vunpack.c.l.bf16 %v3684_v0 }
 0x497   : > { %v3608_v7 = vpop.eup %3607  ;;  %v2495_v32 = vmul.f32 %v3606_v53, %v4868_v42  ;;  %3627 = vrcp.f32 %v2466_v38  ;;  %v2459_v45 = vmul.f32 1.442695, %v2428_v26  ;;  %v357_v1 = vunpack.c.h.bf16 %v3683_v34 }
 0x498   : > { %v3610_v36 = vpop.eup %3609  ;;  %v2493_v18 = vmul.f32 %v3608_v7, %v4872_v46  ;;  %3629 = vpow2.f32 %v2457_v49  ;;  %v2455_v29 = vmul.f32 1.442695, %v2426_v22  ;;  %v355_v4 = vunpack.c.h.bf16 %v3684_v0 }
 0x499   : > { %v3612_v19 = vpop.eup %3611  ;;  %v2511_v39 = vadd.f32 %v2495_v32, %v352_v20  ;;  %v2496_v44 = vmul.f32 %v3610_v36, %v4877_v43  ;;  %3631 = vpow2.f32 %v2453_v2 }
 0x49a   : > { %v3614_v31 = vpop.eup %3613  ;;  %v2509_v15 = vadd.f32 %v2493_v18, %v350_v14  ;;  %v2494_v27 = vmul.f32 %v3612_v19, %v4881_v40  ;;  %3633 = vpow2.f32 %v2459_v45  ;;  %v3685_v14 = vld [vmem:[%s3773_s20 + $0x28] sm:$0xff]  }
 0x49b   : > { %v3616_v42 = vpop.eup %3615  ;;  %v2512_v8 = vadd.f32 %v2496_v44, %v353_v50  ;;  %v2471_v24 = vadd.f32 1.0, %v3614_v31  ;;  %3635 = vpow2.f32 %v2455_v29  ;;  %v360_v2 = vunpack.c.l.bf16 %v3685_v14 }
 0x49c   : > { %v3618_v46 = vpop.eup %3617  ;;  %v2510_v41 = vadd.f32 %v2494_v27, %v351_v62  ;;  %v2469_v43 = vadd.f32 1.0, %v3616_v42  ;;  %v361_v45 = vunpack.c.h.bf16 %v3685_v14 }
 0x49d   : > { %v3620_v61 = vpop.eup %3619  ;;  %v2853_v40 = vpack.c.bf16 %v2512_v8, %v2511_v39  ;;  %3637 = vrcp.f32 %v2471_v24  ;;  %v2472_v6 = vadd.f32 1.0, %v3618_v46  ;;  %v3687_v8 = vld [vmem:[%s3773_s20 + $0x38] sm:$0xff]  }
 0x49e   : > { %v3622_v12 = vpop.eup %3621  ;;  %v2848_v30 = vpack.c.bf16 %v2510_v41, %v2509_v15  ;;  %3639 = vrcp.f32 %v2469_v43  ;;  %v2470_v33 = vadd.f32 1.0, %v3620_v61  ;;  %v364_v24 = vunpack.c.l.bf16 %v3687_v8  ;;  %v3688_v41 = vld [vmem:[%s3773_s20 + $0x30] sm:$0xff]  }
 0x49f   : > { %v3624_v25 = vpop.eup %3623  ;;  %2885 = vst [vmem:[%s4956_s26 + $0x8] sm:$0xff] %v2853_v40   ;;  %v2499_v20 = vmul.f32 %v3622_v12, %v4888_v63  ;;  %3641 = vrcp.f32 %v2472_v6  ;;  %v362_v43 = vunpack.c.l.bf16 %v3688_v41  ;;  %v363_v40 = vunpack.c.h.bf16 %v3688_v41 }
 0x4a0   : > { %v3626_v52 = vpop.eup %3625  ;;  %2849 = vst [vmem:[%s4956_s26] sm:$0xff] %v2848_v30   ;;  %v2497_v11 = vmul.f32 %v3624_v25, %v4892_v59  ;;  %3643 = vrcp.f32 %v2470_v33 }
 0x4a1   : > { %v3628_v48 = vpop.eup %3627  ;;  %v2515_v16 = vadd.f32 %v2499_v20, %v356_v10  ;;  %v2500_v28 = vmul.f32 %v3626_v52, %v4897_v58 }
 0x4a2   : > { %v3630_v47 = vpop.eup %3629  ;;  %v2513_v56 = vadd.f32 %v2497_v11, %v354_v37  ;;  %v2498_v57 = vmul.f32 %v3628_v48, %v4901_v60  ;;  %v3686_v60 = vld [vmem:[%s3773_s20 + $0x20] sm:$0xff]  }
 0x4a3   : > { %v3632_v17 = vpop.eup %3631  ;;  %v2516_v13 = vadd.f32 %v2500_v28, %v357_v1  ;;  %v2475_v63 = vadd.f32 1.0, %v3630_v47  ;;  %v358_v50 = vunpack.c.l.bf16 %v3686_v60  ;;  %v359_v18 = vunpack.c.h.bf16 %v3686_v60 }
 0x4a4   : > { %v3634_v38 = vpop.eup %3633  ;;  %v2514_v49 = vadd.f32 %v2498_v57, %v355_v4  ;;  %v2473_v26 = vadd.f32 1.0, %v3632_v17 }
 0x4a5   : > { %v3636_v53 = vpop.eup %3635  ;;  %v2863_v59 = vpack.c.bf16 %v2516_v13, %v2515_v16  ;;  %3645 = vrcp.f32 %v2475_v63  ;;  %v2476_v3 = vadd.f32 1.0, %v3634_v38 }
 0x4a6   : > { %v2858_v58 = vpack.c.bf16 %v2514_v49, %v2513_v56  ;;  %3647 = vrcp.f32 %v2473_v26  ;;  %v2474_v22 = vadd.f32 1.0, %v3636_v53 }
 0x4a7   : > { %v3638_v7 = vpop.eup %3637  ;;  %2887 = vst [vmem:[%s4956_s26 + $0x18] sm:$0xff] %v2863_v59   ;;  %3649 = vrcp.f32 %v2476_v3 }
 0x4a8   : > { %v3640_v32 = vpop.eup %3639  ;;  %2886 = vst [vmem:[%s4956_s26 + $0x10] sm:$0xff] %v2858_v58   ;;  %v2503_v36 = vmul.f32 %v3638_v7, %v4908_v9  ;;  %3651 = vrcp.f32 %v2474_v22 }
 0x4a9   : > { %v3642_v62 = vpop.eup %3641  ;;  %v2501_v29 = vmul.f32 %v3640_v32, %v4912_v51  ;;  %v365_v51 = vunpack.c.h.bf16 %v3687_v8 }
 0x4aa   : > { %v3644_v19 = vpop.eup %3643  ;;  %v2519_v39 = vadd.f32 %v2503_v36, %v360_v2  ;;  %v2504_v44 = vmul.f32 %v3642_v62, %v4917_v21 }
 0x4ab   : > { %v2517_v31 = vadd.f32 %v2501_v29, %v358_v50  ;;  %v2502_v15 = vmul.f32 %v3644_v19, %v4921_v5 }
 0x4ac   : > { %v2520_v27 = vadd.f32 %v2504_v44, %v361_v45 }
 0x4ad   : > { %v2518_v42 = vadd.f32 %v2502_v15, %v359_v18 }
 0x4ae   : > { %v2873_v9 = vpack.c.bf16 %v2520_v27, %v2519_v39 }
 0x4af   : > { %v3646_v46 = vpop.eup %3645  ;;  %v2868_v61 = vpack.c.bf16 %v2518_v42, %v2517_v31 }
 0x4b0   : > { %v3648_v34 = vpop.eup %3647  ;;  %2889 = vst [vmem:[%s4956_s26 + $0x28] sm:$0xff] %v2873_v9   ;;  %v2507_v21 = vmul.f32 %v3646_v46, %v4929_v55 }
 0x4b1   : > { %v3650_v10 = vpop.eup %3649  ;;  %2888 = vst [vmem:[%s4956_s26 + $0x20] sm:$0xff] %v2868_v61   ;;  %v2505_v5 = vmul.f32 %v3648_v34, %v4933_v23 }
 0x4b2   : > { %v3652_v6 = vpop.eup %3651  ;;  %v2523_v12 = vadd.f32 %v2507_v21, %v364_v24  ;;  %v2508_v0 = vmul.f32 %v3650_v10, %v4938_v54 }
 0x4b3   : > { %v2521_v37 = vadd.f32 %v2505_v5, %v362_v43  ;;  %v2506_v30 = vmul.f32 %v3652_v6, %v4942_v35 }
 0x4b4   : > { %v2524_v33 = vadd.f32 %v2508_v0, %v365_v51 }
 0x4b5   : > { %v2522_v25 = vadd.f32 %v2506_v30, %v363_v40 }
 0x4b6   : > { %v2883_v1 = vpack.c.bf16 %v2524_v33, %v2523_v12 }
 0x4b7   : > { %v2878_v20 = vpack.c.bf16 %v2522_v25, %v2521_v37 }
 0x4b8   : > { %2891 = vst [vmem:[%s4956_s26 + $0x38] sm:$0xff] %v2883_v1  }
 0x4b9   : > { %2890 = vst [vmem:[%s4956_s26 + $0x30] sm:$0xff] %v2878_v20  }
 0x4ba PF: > { %s19_s30 = sadd.s32 1, %s3695_s30  }
 0x4bb   : > { %p16_p4 = scmp.ge.s32.totalorder %s19_s30, 4  }
 0x4bd   :  { %18 = sbr.rel (!%p16_p4) target bundleno = 1 (0x1), region = 86 }

</bundles_post_ra>
